<compile_context>
chip_gen: v7x
topology: tpu7x:2x2x1
jax: 0.10.0
libtpu: 0.0.40
codegen_flags: <defaults>
</compile_context>

<pallas_src>
import jax
import jax.numpy as jnp
from jax.experimental import pallas as pl
from jax.experimental.pallas import tpu as pltpu

EPS = 1e-5  # nn.GroupNorm default


# ----------------------------------------------------------------------------
# in-kernel helpers
# ----------------------------------------------------------------------------
def _group_norm(x, gamma, beta, num_groups):
    """GroupNorm of one sample in channels-leading [C, HW] layout.

    Two-pass statistics: lane reductions to [C, 1], then tiny group reductions
    over sublanes.  Groups are contiguous channel blocks (matches nn.GroupNorm).
    """
    C, HW = x.shape
    cg = C // num_groups
    inv_n = 1.0 / float(cg * HW)

    def group_reduce(v):                       # v: [C, 1] per-channel sums
        g = jnp.sum(v.reshape(num_groups, cg, 1), axis=1, keepdims=True)
        return jnp.broadcast_to(g, (num_groups, cg, 1)).reshape(C, 1)

    mean = group_reduce(jnp.sum(x, axis=1, keepdims=True)) * inv_n        # [C,1]
    d = x - mean
    var = group_reduce(jnp.sum(d * d, axis=1, keepdims=True)) * inv_n     # [C,1]
    return d * jax.lax.rsqrt(var + EPS) * gamma + beta


def _make_kernel(H, W, L, G1, G3, b_blk, mm_dtype):
    P = L // 2
    HW = H * W

    def kernel(x_ref, wm_ref, pc_ref, wa_ref, wb_ref, pq_ref, o_ref,
               y_scr, h_scr):
        C = x_ref.shape[1]

        # packed per-channel parameters (column order set by the host wrapper)
        b_dw = pc_ref[:, 0:1]
        g1, be1 = pc_ref[:, 1:2], pc_ref[:, 2:3]
        g2, be2 = pc_ref[:, 3:4], pc_ref[:, 4:5]
        ba = pc_ref[:, 5:6]
        g3, be3 = pq_ref[:, 0:1], pq_ref[:, 1:2]
        bb = pq_ref[:, 2:3]

        # -- stage 1 (per sample): depthwise LxL conv + residual, GN1, relu.
        # Tap (dy,dx) reads x at flat offset off = (dy-P)*W + (dx-P); in the
        # [C, HW] layout that is a static lane rotation (pltpu.roll, XLU slot)
        # multiplied by the host-prefolded mask*weight table wm[k] (the 0/1
        # boundary mask implements the zero padding and kills wrap-around).
        for b in range(b_blk):                     # small static sample block
            xb = x_ref[b]                          # [C, HW] f32
            acc = xb + b_dw                        # residual + dw bias in the init
            for dy in range(L):
                for dx in range(L):
                    k = dy * L + dx
                    off = (dy - P) * W + (dx - P)
                    shift = (-off) % HW            # out[p] = xb[(p + off) % HW]
                    rolled = xb if shift == 0 else pltpu.roll(xb, shift, axis=1)
                    acc = acc + rolled * wm_ref[k]  # one FMA per tap
            y = jnp.maximum(_group_norm(acc, g1, be1, G1), 0.0)
            y_scr[:, b * HW:(b + 1) * HW] = y      # aligned lane slice (HW % 128 == 0)

        # -- stage 2: relu(GN2(conv01(conv00(y)) + y)); the fused 1x1 convs are
        # ONE MXU dot over the whole sample block [C, b_blk*HW].
        y_all = y_scr[...]
        h_all = jnp.dot(wa_ref[...], y_all.astype(mm_dtype),
                        preferred_element_type=jnp.float32) + ba + y_all
        for b in range(b_blk):                     # GroupNorm stats are per sample
            hb = h_all[:, b * HW:(b + 1) * HW]
            h_scr[:, b * HW:(b + 1) * HW] = jnp.maximum(
                _group_norm(hb, g2, be2, G1), 0.0)

        # -- stage 3: GN3(conv11(conv10(h))); again one dot for the whole block.
        z_all = jnp.dot(wb_ref[...], h_scr[...].astype(mm_dtype),
                        preferred_element_type=jnp.float32) + bb
        for b in range(b_blk):
            zb = z_all[:, b * HW:(b + 1) * HW]
            o_ref[b] = _group_norm(zb, g3, be3, G3).astype(o_ref.dtype)

    return kernel


# ----------------------------------------------------------------------------
# host-side wrapper
# ----------------------------------------------------------------------------
def _tap_masks(H, W, L):
    """[L*L, H*W] 0/1 masks: tap (dy,dx) reads inside the image (zero padding)."""
    P = L // 2
    y = jnp.arange(H).reshape(H, 1)
    x = jnp.arange(W).reshape(1, W)
    rows = []
    for dy in range(L):
        for dx in range(L):
            oy, ox = dy - P, dx - P
            m = ((y + oy >= 0) & (y + oy < H) & (x + ox >= 0) & (x + ox < W))
            rows.append(m.reshape(H * W))
    return jnp.stack(rows, axis=0).astype(jnp.float32)


def _pick_b_blk(N):
    """Samples per grid step: <=4 (vreg pressure), prefer no padded rows and an
    even number of grid steps (v7x shards the parallel axis over 2 cores)."""
    best, best_key = 1, None
    for cand in range(1, min(4, N) + 1):
        steps = -(-N // cand)
        pad = steps * cand - N
        key = (pad, steps % 2, -cand)
        if best_key is None or key < best_key:
            best, best_key = cand, key
    return best


def direct_block_forward(x_nchw, params, *, b_blk=None, use_bf16=True):
    """DirectBlock forward.  x_nchw: [N, C, H, W] f32 -> [N, Cout, H, W] f32."""
    N, C, H, W = x_nchw.shape
    wdw_llc = params['w_dw']                       # [L, L, C]
    L = wdw_llc.shape[0]
    Cout = params['w11'].shape[1]
    HW = H * W
    G1, G3 = C // 4, Cout // 4                     # nn.GroupNorm(num_channels // 4)
    mm_dtype = jnp.bfloat16 if use_bf16 else jnp.float32

    if b_blk is None:
        b_blk = _pick_b_blk(N)
    n_steps = pl.cdiv(N, b_blk)
    n_padded = n_steps * b_blk

    # NCHW -> [N, C, H*W] is a free reshape: channels in sublanes, spatial in
    # lanes (lane-dense).  No host transpose and no spatial zero padding in HBM.
    x = x_nchw.reshape(N, C, HW).astype(jnp.float32)
    if n_padded != N:
        x = jnp.concatenate(
            [x, jnp.zeros((n_padded - N, C, HW), jnp.float32)], axis=0)

    # fuse the back-to-back 1x1 convs (exact: no nonlinearity between them)
    wa = (params['w00'] @ params['w01']).T.astype(mm_dtype)               # [C, C]
    ba = (params['b00'] @ params['w01'] + params['b01']).reshape(C, 1)
    wb = (params['w10'] @ params['w11']).T.astype(mm_dtype)               # [Cout, C]
    bb = (params['b10'] @ params['w11'] + params['b11']).reshape(Cout, 1)

    # pre-fold boundary mask x tap weight into one resident table [L*L, C, HW]
    wdw = wdw_llc.reshape(L * L, C).astype(jnp.float32)                   # [L*L, C]
    masks = _tap_masks(H, W, L)                                           # [L*L, HW]
    wm = (wdw[:, :, None] * masks[:, None, :]).astype(jnp.float32)        # [L*L, C, HW]

    # pack the small per-channel vectors into two arrays (fewer DMAs / tiles)
    pc = jnp.concatenate(
        [params['b_dw'].reshape(C, 1),
         params['g1'].reshape(C, 1), params['be1'].reshape(C, 1),
         params['g2'].reshape(C, 1), params['be2'].reshape(C, 1),
         ba], axis=1).astype(jnp.float32)                                 # [C, 6]
    pq = jnp.concatenate(
        [params['g3'].reshape(Cout, 1), params['be3'].reshape(Cout, 1),
         bb], axis=1).astype(jnp.float32)                                 # [Cout, 3]

    kernel = _make_kernel(H, W, L, G1, G3, b_blk, mm_dtype)

    def rep(shape):
        return pl.BlockSpec(shape, lambda *_: (0,) * len(shape))

    # Explicit VMEM budget: 2x double-buffered in/out blocks + resident tables
    # + the two [C, b_blk*HW] scratches, with 2x headroom; capped well below
    # v7x's 64 MiB physical VMEM (v5e default scoped limit is only 16 MiB).
    in_bytes = (b_blk * C * HW + L * L * C * HW + C * 6 + Cout * 3) * 4 \
        + (C * C + Cout * C) * (2 if use_bf16 else 4)
    out_bytes = b_blk * Cout * HW * 4
    scratch_bytes = 2 * C * b_blk * HW * 4
    needed = 2 * (in_bytes + out_bytes) + scratch_bytes
    vmem_limit = int(min(48 << 20, max(2 * needed, 16 << 20)))

    out = pl.pallas_call(
        kernel,
        out_shape=jax.ShapeDtypeStruct((n_padded, Cout, HW), jnp.float32),
        grid=(n_steps,),
        in_specs=[
            pl.BlockSpec((b_blk, C, HW), lambda n: (n, 0, 0)),
            rep((L * L, C, HW)),      # prefolded mask*weight table (resident)
            rep((C, 6)),
            rep((C, C)),
            rep((Cout, C)),
            rep((Cout, 3)),
        ],
        out_specs=pl.BlockSpec((b_blk, Cout, HW), lambda n: (n, 0, 0)),
        scratch_shapes=[
            pltpu.VMEM((C, b_blk * HW), jnp.float32),   # stage-1 outputs
            pltpu.VMEM((C, b_blk * HW), jnp.float32),   # stage-2 outputs
        ],
        compiler_params=pltpu.CompilerParams(
            dimension_semantics=("parallel",),          # independent batch blocks
            vmem_limit_bytes=vmem_limit),
    )(x, wm, pc, wa, wb, pq)

    return out[:N].reshape(N, Cout, H, W)


# ----------------------------------------------------------------------------
# pure-JAX reference (for correctness check)
# ----------------------------------------------------------------------------
def ref_forward(x_nchw, params):
    x = jnp.transpose(x_nchw, (0, 2, 3, 1)).astype(jnp.float32)
    wdw = params['w_dw']
    L = wdw.shape[0]
    C = x.shape[-1]
    Cout = params['w11'].shape[1]
    G1, G3 = C // 4, Cout // 4

    def gn(v, gamma, beta, G):
        N, H, W, Cc = v.shape
        vg = v.reshape(N, H, W, G, Cc // G)
        mean = vg.mean(axis=(1, 2, 4), keepdims=True)
        var = vg.var(axis=(1, 2, 4), keepdims=True)
        vn = ((vg - mean) / jnp.sqrt(var + EPS)).reshape(N, H, W, Cc)
        return vn * gamma.reshape(1, 1, 1, -1) + beta.reshape(1, 1, 1, -1)

    def pw(v, w, b):
        return jnp.einsum('nhwc,cd->nhwd', v, w) + b.reshape(1, 1, 1, -1)

    dw = jax.lax.conv_general_dilated(
        x, wdw.reshape(L, L, 1, C), (1, 1),
        ((L // 2, L // 2), (L // 2, L // 2)),
        dimension_numbers=('NHWC', 'HWIO', 'NHWC'),
        feature_group_count=C) + params['b_dw'].reshape(1, 1, 1, -1)

    h = jax.nn.relu(gn(x + dw, params['g1'], params['be1'], G1))
    h2 = pw(pw(h, params['w00'], params['b00']), params['w01'], params['b01'])
    h = jax.nn.relu(gn(h2 + h, params['g2'], params['be2'], G1))
    h3 = pw(pw(h, params['w10'], params['b10']), params['w11'], params['b11'])
    out = gn(h3, params['g3'], params['be3'], G3)
    return jnp.transpose(out, (0, 3, 1, 2))


# ----------------------------------------------------------------------------
if __name__ == "__main__":
    key = jax.random.PRNGKey(0)
    N, C, H, W = 2, 8, 16, 16          # in_channels=8 (divisible by 4 for GroupNorm)
    Cout = 8                           # out_channels (divisible by 4 for GroupNorm)
    L, S, stride = 5, 3, 1             # small_kernel S unused in DirectBlock.forward
    C15 = int(C * 1.5)                 # hidden width of the 1x1-conv MLPs

    ks = jax.random.split(key, 32)

    def rnd(i, shape, scale=0.2):
        return scale * jax.random.normal(ks[i], shape, jnp.float32)

    # deterministic synthetic parameters (shapes follow nn.Conv2d / nn.GroupNorm)
    params = dict(
        w_dw=rnd(1, (L, L, C)),  b_dw=rnd(2, (1, C)),       # depthwise conv1
        w00=rnd(3, (C, C15)),    b00=rnd(4, (1, C15)),      # conv00 1x1
        w01=rnd(5, (C15, C)),    b01=rnd(6, (1, C)),        # conv01 1x1
        w10=rnd(7, (C, C15)),    b10=rnd(8, (1, C15)),      # conv10 1x1
        w11=rnd(9, (C15, Cout)), b11=rnd(10, (1, Cout)),    # conv11 1x1
        g1=1.0 + rnd(11, (1, C), 0.1),    be1=rnd(12, (1, C), 0.1),
        g2=1.0 + rnd(13, (1, C), 0.1),    be2=rnd(14, (1, C), 0.1),
        g3=1.0 + rnd(15, (1, Cout), 0.1), be3=rnd(16, (1, Cout), 0.1),
    )

    x = jax.random.normal(ks[0], (N, C, H, W), jnp.float32)

    out = direct_block_forward(x, params)
    out = jax.block_until_ready(out)
    assert out.shape == (N, Cout, H, W), out.shape

    ref = ref_forward(x, params)
    err = float(jnp.max(jnp.abs(out - ref)))
    # bf16 MXU operands (f32 accumulation) vs. a pure-f32 reference.
    assert err < 3e-2, f"max abs err {err}"

    print("KERNEL_OK")
</pallas_src>

<mosaic_0001>
module attributes {stable_mosaic.version = 11 : i64} {
  func.func @kernel(%arg0: i32, %arg1: memref<1x8x256xf32, #tpu.memory_space<vmem>>, %arg2: memref<25x8x256xf32, #tpu.memory_space<vmem>>, %arg3: memref<8x6xf32, #tpu.memory_space<vmem>>, %arg4: memref<8x8xbf16, #tpu.memory_space<vmem>>, %arg5: memref<8x8xbf16, #tpu.memory_space<vmem>>, %arg6: memref<8x3xf32, #tpu.memory_space<vmem>>, %arg7: memref<1x8x256xf32, #tpu.memory_space<vmem>>, %arg8: memref<8x256xf32, #tpu.memory_space<vmem>>, %arg9: memref<8x256xf32, #tpu.memory_space<vmem>>) attributes {dimension_semantics = [#tpu.dimension_semantics<parallel>], iteration_bounds = array<i64: 2>, scalar_prefetch = 0 : i64, scratch_operands = 2 : i64, tpu.core_type = #tpu.core_type<tc>, window_params = [{transform_indices = @transform_0, window_bounds = array<i64: 1, 8, 256>}, {pipeline_mode = #tpu.pipeline_mode<synchronous>, transform_indices = @transform_1, window_bounds = array<i64: 25, 8, 256>}, {pipeline_mode = #tpu.pipeline_mode<synchronous>, transform_indices = @transform_2, window_bounds = array<i64: 8, 6>}, {pipeline_mode = #tpu.pipeline_mode<synchronous>, transform_indices = @transform_3, window_bounds = array<i64: 8, 8>}, {pipeline_mode = #tpu.pipeline_mode<synchronous>, transform_indices = @transform_4, window_bounds = array<i64: 8, 8>}, {pipeline_mode = #tpu.pipeline_mode<synchronous>, transform_indices = @transform_5, window_bounds = array<i64: 8, 3>}, {transform_indices = @transform_6, window_bounds = array<i64: 1, 8, 256>}]} {
    %c0 = arith.constant 0 : index
    %c0_0 = arith.constant 0 : index
    %0 = vector.load %arg3[%c0, %c0_0] : memref<8x6xf32, #tpu.memory_space<vmem>>, vector<8x1xf32>
    %c0_1 = arith.constant 0 : index
    %c1 = arith.constant 1 : index
    %1 = vector.load %arg3[%c0_1, %c1] : memref<8x6xf32, #tpu.memory_space<vmem>>, vector<8x1xf32>
    %c0_2 = arith.constant 0 : index
    %c2 = arith.constant 2 : index
    %2 = vector.load %arg3[%c0_2, %c2] : memref<8x6xf32, #tpu.memory_space<vmem>>, vector<8x1xf32>
    %c0_3 = arith.constant 0 : index
    %c3 = arith.constant 3 : index
    %3 = vector.load %arg3[%c0_3, %c3] : memref<8x6xf32, #tpu.memory_space<vmem>>, vector<8x1xf32>
    %c0_4 = arith.constant 0 : index
    %c4 = arith.constant 4 : index
    %4 = vector.load %arg3[%c0_4, %c4] : memref<8x6xf32, #tpu.memory_space<vmem>>, vector<8x1xf32>
    %c0_5 = arith.constant 0 : index
    %c5 = arith.constant 5 : index
    %5 = vector.load %arg3[%c0_5, %c5] : memref<8x6xf32, #tpu.memory_space<vmem>>, vector<8x1xf32>
    %c0_6 = arith.constant 0 : index
    %c0_7 = arith.constant 0 : index
    %6 = vector.load %arg6[%c0_6, %c0_7] : memref<8x3xf32, #tpu.memory_space<vmem>>, vector<8x1xf32>
    %c0_8 = arith.constant 0 : index
    %c1_9 = arith.constant 1 : index
    %7 = vector.load %arg6[%c0_8, %c1_9] : memref<8x3xf32, #tpu.memory_space<vmem>>, vector<8x1xf32>
    %c0_10 = arith.constant 0 : index
    %c2_11 = arith.constant 2 : index
    %8 = vector.load %arg6[%c0_10, %c2_11] : memref<8x3xf32, #tpu.memory_space<vmem>>, vector<8x1xf32>
    %c0_12 = arith.constant 0 : index
    %c0_13 = arith.constant 0 : index
    %c0_14 = arith.constant 0 : index
    %9 = vector.load %arg1[%c0_12, %c0_13, %c0_14] : memref<1x8x256xf32, #tpu.memory_space<vmem>>, vector<1x8x256xf32>
    %10 = vector.shape_cast %9 : vector<1x8x256xf32> to vector<8x256xf32>
    %11 = vector.broadcast %0 : vector<8x1xf32> to vector<8x256xf32>
    %12 = arith.addf %10, %11 : vector<8x256xf32>
    %c34_i32 = arith.constant 34 : i32
    %13 = tpu.dynamic_rotate %10 by %c34_i32 dim 1 : vector<8x256xf32>, i32 -> vector<8x256xf32>
    %c0_15 = arith.constant 0 : index
    %c0_16 = arith.constant 0 : index
    %c0_17 = arith.constant 0 : index
    %14 = vector.load %arg2[%c0_15, %c0_16, %c0_17] : memref<25x8x256xf32, #tpu.memory_space<vmem>>, vector<1x8x256xf32>
    %15 = vector.shape_cast %14 : vector<1x8x256xf32> to vector<8x256xf32>
    %16 = arith.mulf %13, %15 : vector<8x256xf32>
    %17 = arith.addf %12, %16 : vector<8x256xf32>
    %c33_i32 = arith.constant 33 : i32
    %18 = tpu.dynamic_rotate %10 by %c33_i32 dim 1 : vector<8x256xf32>, i32 -> vector<8x256xf32>
    %c1_18 = arith.constant 1 : index
    %c0_19 = arith.constant 0 : index
    %c0_20 = arith.constant 0 : index
    %19 = vector.load %arg2[%c1_18, %c0_19, %c0_20] : memref<25x8x256xf32, #tpu.memory_space<vmem>>, vector<1x8x256xf32>
    %20 = vector.shape_cast %19 : vector<1x8x256xf32> to vector<8x256xf32>
    %21 = arith.mulf %18, %20 : vector<8x256xf32>
    %22 = arith.addf %17, %21 : vector<8x256xf32>
    %c32_i32 = arith.constant 32 : i32
    %23 = tpu.dynamic_rotate %10 by %c32_i32 dim 1 : vector<8x256xf32>, i32 -> vector<8x256xf32>
    %c2_21 = arith.constant 2 : index
    %c0_22 = arith.constant 0 : index
    %c0_23 = arith.constant 0 : index
    %24 = vector.load %arg2[%c2_21, %c0_22, %c0_23] : memref<25x8x256xf32, #tpu.memory_space<vmem>>, vector<1x8x256xf32>
    %25 = vector.shape_cast %24 : vector<1x8x256xf32> to vector<8x256xf32>
    %26 = arith.mulf %23, %25 : vector<8x256xf32>
    %27 = arith.addf %22, %26 : vector<8x256xf32>
    %c31_i32 = arith.constant 31 : i32
    %28 = tpu.dynamic_rotate %10 by %c31_i32 dim 1 : vector<8x256xf32>, i32 -> vector<8x256xf32>
    %c3_24 = arith.constant 3 : index
    %c0_25 = arith.constant 0 : index
    %c0_26 = arith.constant 0 : index
    %29 = vector.load %arg2[%c3_24, %c0_25, %c0_26] : memref<25x8x256xf32, #tpu.memory_space<vmem>>, vector<1x8x256xf32>
    %30 = vector.shape_cast %29 : vector<1x8x256xf32> to vector<8x256xf32>
    %31 = arith.mulf %28, %30 : vector<8x256xf32>
    %32 = arith.addf %27, %31 : vector<8x256xf32>
    %c30_i32 = arith.constant 30 : i32
    %33 = tpu.dynamic_rotate %10 by %c30_i32 dim 1 : vector<8x256xf32>, i32 -> vector<8x256xf32>
    %c4_27 = arith.constant 4 : index
    %c0_28 = arith.constant 0 : index
    %c0_29 = arith.constant 0 : index
    %34 = vector.load %arg2[%c4_27, %c0_28, %c0_29] : memref<25x8x256xf32, #tpu.memory_space<vmem>>, vector<1x8x256xf32>
    %35 = vector.shape_cast %34 : vector<1x8x256xf32> to vector<8x256xf32>
    %36 = arith.mulf %33, %35 : vector<8x256xf32>
    %37 = arith.addf %32, %36 : vector<8x256xf32>
    %c18_i32 = arith.constant 18 : i32
    %38 = tpu.dynamic_rotate %10 by %c18_i32 dim 1 : vector<8x256xf32>, i32 -> vector<8x256xf32>
    %c5_30 = arith.constant 5 : index
    %c0_31 = arith.constant 0 : index
    %c0_32 = arith.constant 0 : index
    %39 = vector.load %arg2[%c5_30, %c0_31, %c0_32] : memref<25x8x256xf32, #tpu.memory_space<vmem>>, vector<1x8x256xf32>
    %40 = vector.shape_cast %39 : vector<1x8x256xf32> to vector<8x256xf32>
    %41 = arith.mulf %38, %40 : vector<8x256xf32>
    %42 = arith.addf %37, %41 : vector<8x256xf32>
    %c17_i32 = arith.constant 17 : i32
    %43 = tpu.dynamic_rotate %10 by %c17_i32 dim 1 : vector<8x256xf32>, i32 -> vector<8x256xf32>
    %c6 = arith.constant 6 : index
    %c0_33 = arith.constant 0 : index
    %c0_34 = arith.constant 0 : index
    %44 = vector.load %arg2[%c6, %c0_33, %c0_34] : memref<25x8x256xf32, #tpu.memory_space<vmem>>, vector<1x8x256xf32>
    %45 = vector.shape_cast %44 : vector<1x8x256xf32> to vector<8x256xf32>
    %46 = arith.mulf %43, %45 : vector<8x256xf32>
    %47 = arith.addf %42, %46 : vector<8x256xf32>
    %c16_i32 = arith.constant 16 : i32
    %48 = tpu.dynamic_rotate %10 by %c16_i32 dim 1 : vector<8x256xf32>, i32 -> vector<8x256xf32>
    %c7 = arith.constant 7 : index
    %c0_35 = arith.constant 0 : index
    %c0_36 = arith.constant 0 : index
    %49 = vector.load %arg2[%c7, %c0_35, %c0_36] : memref<25x8x256xf32, #tpu.memory_space<vmem>>, vector<1x8x256xf32>
    %50 = vector.shape_cast %49 : vector<1x8x256xf32> to vector<8x256xf32>
    %51 = arith.mulf %48, %50 : vector<8x256xf32>
    %52 = arith.addf %47, %51 : vector<8x256xf32>
    %c15_i32 = arith.constant 15 : i32
    %53 = tpu.dynamic_rotate %10 by %c15_i32 dim 1 : vector<8x256xf32>, i32 -> vector<8x256xf32>
    %c8 = arith.constant 8 : index
    %c0_37 = arith.constant 0 : index
    %c0_38 = arith.constant 0 : index
    %54 = vector.load %arg2[%c8, %c0_37, %c0_38] : memref<25x8x256xf32, #tpu.memory_space<vmem>>, vector<1x8x256xf32>
    %55 = vector.shape_cast %54 : vector<1x8x256xf32> to vector<8x256xf32>
    %56 = arith.mulf %53, %55 : vector<8x256xf32>
    %57 = arith.addf %52, %56 : vector<8x256xf32>
    %c14_i32 = arith.constant 14 : i32
    %58 = tpu.dynamic_rotate %10 by %c14_i32 dim 1 : vector<8x256xf32>, i32 -> vector<8x256xf32>
    %c9 = arith.constant 9 : index
    %c0_39 = arith.constant 0 : index
    %c0_40 = arith.constant 0 : index
    %59 = vector.load %arg2[%c9, %c0_39, %c0_40] : memref<25x8x256xf32, #tpu.memory_space<vmem>>, vector<1x8x256xf32>
    %60 = vector.shape_cast %59 : vector<1x8x256xf32> to vector<8x256xf32>
    %61 = arith.mulf %58, %60 : vector<8x256xf32>
    %62 = arith.addf %57, %61 : vector<8x256xf32>
    %c2_i32 = arith.constant 2 : i32
    %63 = tpu.dynamic_rotate %10 by %c2_i32 dim 1 : vector<8x256xf32>, i32 -> vector<8x256xf32>
    %c10 = arith.constant 10 : index
    %c0_41 = arith.constant 0 : index
    %c0_42 = arith.constant 0 : index
    %64 = vector.load %arg2[%c10, %c0_41, %c0_42] : memref<25x8x256xf32, #tpu.memory_space<vmem>>, vector<1x8x256xf32>
    %65 = vector.shape_cast %64 : vector<1x8x256xf32> to vector<8x256xf32>
    %66 = arith.mulf %63, %65 : vector<8x256xf32>
    %67 = arith.addf %62, %66 : vector<8x256xf32>
    %c1_i32 = arith.constant 1 : i32
    %68 = tpu.dynamic_rotate %10 by %c1_i32 dim 1 : vector<8x256xf32>, i32 -> vector<8x256xf32>
    %c11 = arith.constant 11 : index
    %c0_43 = arith.constant 0 : index
    %c0_44 = arith.constant 0 : index
    %69 = vector.load %arg2[%c11, %c0_43, %c0_44] : memref<25x8x256xf32, #tpu.memory_space<vmem>>, vector<1x8x256xf32>
    %70 = vector.shape_cast %69 : vector<1x8x256xf32> to vector<8x256xf32>
    %71 = arith.mulf %68, %70 : vector<8x256xf32>
    %72 = arith.addf %67, %71 : vector<8x256xf32>
    %c12 = arith.constant 12 : index
    %c0_45 = arith.constant 0 : index
    %c0_46 = arith.constant 0 : index
    %73 = vector.load %arg2[%c12, %c0_45, %c0_46] : memref<25x8x256xf32, #tpu.memory_space<vmem>>, vector<1x8x256xf32>
    %74 = vector.shape_cast %73 : vector<1x8x256xf32> to vector<8x256xf32>
    %75 = arith.mulf %10, %74 : vector<8x256xf32>
    %76 = arith.addf %72, %75 : vector<8x256xf32>
    %c255_i32 = arith.constant 255 : i32
    %77 = tpu.dynamic_rotate %10 by %c255_i32 dim 1 : vector<8x256xf32>, i32 -> vector<8x256xf32>
    %c13 = arith.constant 13 : index
    %c0_47 = arith.constant 0 : index
    %c0_48 = arith.constant 0 : index
    %78 = vector.load %arg2[%c13, %c0_47, %c0_48] : memref<25x8x256xf32, #tpu.memory_space<vmem>>, vector<1x8x256xf32>
    %79 = vector.shape_cast %78 : vector<1x8x256xf32> to vector<8x256xf32>
    %80 = arith.mulf %77, %79 : vector<8x256xf32>
    %81 = arith.addf %76, %80 : vector<8x256xf32>
    %c254_i32 = arith.constant 254 : i32
    %82 = tpu.dynamic_rotate %10 by %c254_i32 dim 1 : vector<8x256xf32>, i32 -> vector<8x256xf32>
    %c14 = arith.constant 14 : index
    %c0_49 = arith.constant 0 : index
    %c0_50 = arith.constant 0 : index
    %83 = vector.load %arg2[%c14, %c0_49, %c0_50] : memref<25x8x256xf32, #tpu.memory_space<vmem>>, vector<1x8x256xf32>
    %84 = vector.shape_cast %83 : vector<1x8x256xf32> to vector<8x256xf32>
    %85 = arith.mulf %82, %84 : vector<8x256xf32>
    %86 = arith.addf %81, %85 : vector<8x256xf32>
    %c242_i32 = arith.constant 242 : i32
    %87 = tpu.dynamic_rotate %10 by %c242_i32 dim 1 : vector<8x256xf32>, i32 -> vector<8x256xf32>
    %c15 = arith.constant 15 : index
    %c0_51 = arith.constant 0 : index
    %c0_52 = arith.constant 0 : index
    %88 = vector.load %arg2[%c15, %c0_51, %c0_52] : memref<25x8x256xf32, #tpu.memory_space<vmem>>, vector<1x8x256xf32>
    %89 = vector.shape_cast %88 : vector<1x8x256xf32> to vector<8x256xf32>
    %90 = arith.mulf %87, %89 : vector<8x256xf32>
    %91 = arith.addf %86, %90 : vector<8x256xf32>
    %c241_i32 = arith.constant 241 : i32
    %92 = tpu.dynamic_rotate %10 by %c241_i32 dim 1 : vector<8x256xf32>, i32 -> vector<8x256xf32>
    %c16 = arith.constant 16 : index
    %c0_53 = arith.constant 0 : index
    %c0_54 = arith.constant 0 : index
    %93 = vector.load %arg2[%c16, %c0_53, %c0_54] : memref<25x8x256xf32, #tpu.memory_space<vmem>>, vector<1x8x256xf32>
    %94 = vector.shape_cast %93 : vector<1x8x256xf32> to vector<8x256xf32>
    %95 = arith.mulf %92, %94 : vector<8x256xf32>
    %96 = arith.addf %91, %95 : vector<8x256xf32>
    %c240_i32 = arith.constant 240 : i32
    %97 = tpu.dynamic_rotate %10 by %c240_i32 dim 1 : vector<8x256xf32>, i32 -> vector<8x256xf32>
    %c17 = arith.constant 17 : index
    %c0_55 = arith.constant 0 : index
    %c0_56 = arith.constant 0 : index
    %98 = vector.load %arg2[%c17, %c0_55, %c0_56] : memref<25x8x256xf32, #tpu.memory_space<vmem>>, vector<1x8x256xf32>
    %99 = vector.shape_cast %98 : vector<1x8x256xf32> to vector<8x256xf32>
    %100 = arith.mulf %97, %99 : vector<8x256xf32>
    %101 = arith.addf %96, %100 : vector<8x256xf32>
    %c239_i32 = arith.constant 239 : i32
    %102 = tpu.dynamic_rotate %10 by %c239_i32 dim 1 : vector<8x256xf32>, i32 -> vector<8x256xf32>
    %c18 = arith.constant 18 : index
    %c0_57 = arith.constant 0 : index
    %c0_58 = arith.constant 0 : index
    %103 = vector.load %arg2[%c18, %c0_57, %c0_58] : memref<25x8x256xf32, #tpu.memory_space<vmem>>, vector<1x8x256xf32>
    %104 = vector.shape_cast %103 : vector<1x8x256xf32> to vector<8x256xf32>
    %105 = arith.mulf %102, %104 : vector<8x256xf32>
    %106 = arith.addf %101, %105 : vector<8x256xf32>
    %c238_i32 = arith.constant 238 : i32
    %107 = tpu.dynamic_rotate %10 by %c238_i32 dim 1 : vector<8x256xf32>, i32 -> vector<8x256xf32>
    %c19 = arith.constant 19 : index
    %c0_59 = arith.constant 0 : index
    %c0_60 = arith.constant 0 : index
    %108 = vector.load %arg2[%c19, %c0_59, %c0_60] : memref<25x8x256xf32, #tpu.memory_space<vmem>>, vector<1x8x256xf32>
    %109 = vector.shape_cast %108 : vector<1x8x256xf32> to vector<8x256xf32>
    %110 = arith.mulf %107, %109 : vector<8x256xf32>
    %111 = arith.addf %106, %110 : vector<8x256xf32>
    %c226_i32 = arith.constant 226 : i32
    %112 = tpu.dynamic_rotate %10 by %c226_i32 dim 1 : vector<8x256xf32>, i32 -> vector<8x256xf32>
    %c20 = arith.constant 20 : index
    %c0_61 = arith.constant 0 : index
    %c0_62 = arith.constant 0 : index
    %113 = vector.load %arg2[%c20, %c0_61, %c0_62] : memref<25x8x256xf32, #tpu.memory_space<vmem>>, vector<1x8x256xf32>
    %114 = vector.shape_cast %113 : vector<1x8x256xf32> to vector<8x256xf32>
    %115 = arith.mulf %112, %114 : vector<8x256xf32>
    %116 = arith.addf %111, %115 : vector<8x256xf32>
    %c225_i32 = arith.constant 225 : i32
    %117 = tpu.dynamic_rotate %10 by %c225_i32 dim 1 : vector<8x256xf32>, i32 -> vector<8x256xf32>
    %c21 = arith.constant 21 : index
    %c0_63 = arith.constant 0 : index
    %c0_64 = arith.constant 0 : index
    %118 = vector.load %arg2[%c21, %c0_63, %c0_64] : memref<25x8x256xf32, #tpu.memory_space<vmem>>, vector<1x8x256xf32>
    %119 = vector.shape_cast %118 : vector<1x8x256xf32> to vector<8x256xf32>
    %120 = arith.mulf %117, %119 : vector<8x256xf32>
    %121 = arith.addf %116, %120 : vector<8x256xf32>
    %c224_i32 = arith.constant 224 : i32
    %122 = tpu.dynamic_rotate %10 by %c224_i32 dim 1 : vector<8x256xf32>, i32 -> vector<8x256xf32>
    %c22 = arith.constant 22 : index
    %c0_65 = arith.constant 0 : index
    %c0_66 = arith.constant 0 : index
    %123 = vector.load %arg2[%c22, %c0_65, %c0_66] : memref<25x8x256xf32, #tpu.memory_space<vmem>>, vector<1x8x256xf32>
    %124 = vector.shape_cast %123 : vector<1x8x256xf32> to vector<8x256xf32>
    %125 = arith.mulf %122, %124 : vector<8x256xf32>
    %126 = arith.addf %121, %125 : vector<8x256xf32>
    %c223_i32 = arith.constant 223 : i32
    %127 = tpu.dynamic_rotate %10 by %c223_i32 dim 1 : vector<8x256xf32>, i32 -> vector<8x256xf32>
    %c23 = arith.constant 23 : index
    %c0_67 = arith.constant 0 : index
    %c0_68 = arith.constant 0 : index
    %128 = vector.load %arg2[%c23, %c0_67, %c0_68] : memref<25x8x256xf32, #tpu.memory_space<vmem>>, vector<1x8x256xf32>
    %129 = vector.shape_cast %128 : vector<1x8x256xf32> to vector<8x256xf32>
    %130 = arith.mulf %127, %129 : vector<8x256xf32>
    %131 = arith.addf %126, %130 : vector<8x256xf32>
    %c222_i32 = arith.constant 222 : i32
    %132 = tpu.dynamic_rotate %10 by %c222_i32 dim 1 : vector<8x256xf32>, i32 -> vector<8x256xf32>
    %c24 = arith.constant 24 : index
    %c0_69 = arith.constant 0 : index
    %c0_70 = arith.constant 0 : index
    %133 = vector.load %arg2[%c24, %c0_69, %c0_70] : memref<25x8x256xf32, #tpu.memory_space<vmem>>, vector<1x8x256xf32>
    %134 = vector.shape_cast %133 : vector<1x8x256xf32> to vector<8x256xf32>
    %135 = arith.mulf %132, %134 : vector<8x256xf32>
    %136 = arith.addf %131, %135 : vector<8x256xf32>
    %cst = arith.constant dense<0.000000e+00> : vector<8xf32>
    %137 = vector.multi_reduction <add>, %136, %cst [1] : vector<8x256xf32> to vector<8xf32>
    %138 = vector.shape_cast %137 : vector<8xf32> to vector<8x1xf32>
    %139 = vector.shape_cast %138 : vector<8x1xf32> to vector<2x4x1xf32>
    %cst_71 = arith.constant dense<0.000000e+00> : vector<2x1xf32>
    %140 = vector.multi_reduction <add>, %139, %cst_71 [1] : vector<2x4x1xf32> to vector<2x1xf32>
    %141 = vector.shape_cast %140 : vector<2x1xf32> to vector<2x1x1xf32>
    %142 = vector.shape_cast %141 : vector<2x1x1xf32> to vector<2x1x1xf32>
    %143 = vector.broadcast %142 : vector<2x1x1xf32> to vector<2x4x1xf32>
    %144 = vector.shape_cast %143 : vector<2x4x1xf32> to vector<8x1xf32>
    %cst_72 = arith.constant 9.765625E-4 : f32
    %145 = vector.broadcast %cst_72 : f32 to vector<8x1xf32>
    %146 = arith.mulf %144, %145 : vector<8x1xf32>
    %147 = vector.broadcast %146 : vector<8x1xf32> to vector<8x256xf32>
    %148 = arith.subf %136, %147 : vector<8x256xf32>
    %149 = arith.mulf %148, %148 : vector<8x256xf32>
    %cst_73 = arith.constant dense<0.000000e+00> : vector<8xf32>
    %150 = vector.multi_reduction <add>, %149, %cst_73 [1] : vector<8x256xf32> to vector<8xf32>
    %151 = vector.shape_cast %150 : vector<8xf32> to vector<8x1xf32>
    %152 = vector.shape_cast %151 : vector<8x1xf32> to vector<2x4x1xf32>
    %cst_74 = arith.constant dense<0.000000e+00> : vector<2x1xf32>
    %153 = vector.multi_reduction <add>, %152, %cst_74 [1] : vector<2x4x1xf32> to vector<2x1xf32>
    %154 = vector.shape_cast %153 : vector<2x1xf32> to vector<2x1x1xf32>
    %155 = vector.shape_cast %154 : vector<2x1x1xf32> to vector<2x1x1xf32>
    %156 = vector.broadcast %155 : vector<2x1x1xf32> to vector<2x4x1xf32>
    %157 = vector.shape_cast %156 : vector<2x4x1xf32> to vector<8x1xf32>
    %cst_75 = arith.constant 9.765625E-4 : f32
    %158 = vector.broadcast %cst_75 : f32 to vector<8x1xf32>
    %159 = arith.mulf %157, %158 : vector<8x1xf32>
    %cst_76 = arith.constant 9.99999974E-6 : f32
    %160 = vector.broadcast %cst_76 : f32 to vector<8x1xf32>
    %161 = arith.addf %159, %160 : vector<8x1xf32>
    %162 = math.rsqrt %161 : vector<8x1xf32>
    %163 = vector.broadcast %162 : vector<8x1xf32> to vector<8x256xf32>
    %164 = arith.mulf %148, %163 : vector<8x256xf32>
    %165 = vector.broadcast %1 : vector<8x1xf32> to vector<8x256xf32>
    %166 = arith.mulf %164, %165 : vector<8x256xf32>
    %167 = vector.broadcast %2 : vector<8x1xf32> to vector<8x256xf32>
    %168 = arith.addf %166, %167 : vector<8x256xf32>
    %cst_77 = arith.constant 0.000000e+00 : f32
    %169 = vector.broadcast %cst_77 : f32 to vector<8x256xf32>
    %170 = arith.maximumf %168, %169 : vector<8x256xf32>
    %c0_78 = arith.constant 0 : index
    %c0_79 = arith.constant 0 : index
    %171 = vector.load %arg8[%c0_78, %c0_79] : memref<8x256xf32, #tpu.memory_space<vmem>>, vector<8x256xf32>
    tpu.vector_store %arg8[%c0_78, %c0_79], %170 {strides = array<i32>} : memref<8x256xf32, #tpu.memory_space<vmem>>, vector<8x256xf32>,
    %c0_80 = arith.constant 0 : index
    %c0_81 = arith.constant 0 : index
    %172 = vector.load %arg8[%c0_80, %c0_81] : memref<8x256xf32, #tpu.memory_space<vmem>>, vector<8x256xf32>
    %c0_82 = arith.constant 0 : index
    %c0_83 = arith.constant 0 : index
    %173 = vector.load %arg4[%c0_82, %c0_83] : memref<8x8xbf16, #tpu.memory_space<vmem>>, vector<8x8xbf16>
    %174 = arith.truncf %172 : vector<8x256xf32> to vector<8x256xbf16>
    %cst_84 = arith.constant dense<0.000000e+00> : vector<8x256xf32>
    %175 = tpu.matmul %173, %174, %cst_84 {dimension_numbers = #tpu.dot_dimension_numbers<[1], [0], [0], [1], [0, 0, 1, 1], [], []>} : vector<8x8xbf16>, vector<8x256xbf16>, vector<8x256xf32> -> vector<8x256xf32>
    %176 = vector.broadcast %5 : vector<8x1xf32> to vector<8x256xf32>
    %177 = arith.addf %175, %176 : vector<8x256xf32>
    %178 = arith.addf %177, %172 : vector<8x256xf32>
    %cst_85 = arith.constant dense<0.000000e+00> : vector<8xf32>
    %179 = vector.multi_reduction <add>, %178, %cst_85 [1] : vector<8x256xf32> to vector<8xf32>
    %180 = vector.shape_cast %179 : vector<8xf32> to vector<8x1xf32>
    %181 = vector.shape_cast %180 : vector<8x1xf32> to vector<2x4x1xf32>
    %cst_86 = arith.constant dense<0.000000e+00> : vector<2x1xf32>
    %182 = vector.multi_reduction <add>, %181, %cst_86 [1] : vector<2x4x1xf32> to vector<2x1xf32>
    %183 = vector.shape_cast %182 : vector<2x1xf32> to vector<2x1x1xf32>
    %184 = vector.shape_cast %183 : vector<2x1x1xf32> to vector<2x1x1xf32>
    %185 = vector.broadcast %184 : vector<2x1x1xf32> to vector<2x4x1xf32>
    %186 = vector.shape_cast %185 : vector<2x4x1xf32> to vector<8x1xf32>
    %cst_87 = arith.constant 9.765625E-4 : f32
    %187 = vector.broadcast %cst_87 : f32 to vector<8x1xf32>
    %188 = arith.mulf %186, %187 : vector<8x1xf32>
    %189 = vector.broadcast %188 : vector<8x1xf32> to vector<8x256xf32>
    %190 = arith.subf %178, %189 : vector<8x256xf32>
    %191 = arith.mulf %190, %190 : vector<8x256xf32>
    %cst_88 = arith.constant dense<0.000000e+00> : vector<8xf32>
    %192 = vector.multi_reduction <add>, %191, %cst_88 [1] : vector<8x256xf32> to vector<8xf32>
    %193 = vector.shape_cast %192 : vector<8xf32> to vector<8x1xf32>
    %194 = vector.shape_cast %193 : vector<8x1xf32> to vector<2x4x1xf32>
    %cst_89 = arith.constant dense<0.000000e+00> : vector<2x1xf32>
    %195 = vector.multi_reduction <add>, %194, %cst_89 [1] : vector<2x4x1xf32> to vector<2x1xf32>
    %196 = vector.shape_cast %195 : vector<2x1xf32> to vector<2x1x1xf32>
    %197 = vector.shape_cast %196 : vector<2x1x1xf32> to vector<2x1x1xf32>
    %198 = vector.broadcast %197 : vector<2x1x1xf32> to vector<2x4x1xf32>
    %199 = vector.shape_cast %198 : vector<2x4x1xf32> to vector<8x1xf32>
    %cst_90 = arith.constant 9.765625E-4 : f32
    %200 = vector.broadcast %cst_90 : f32 to vector<8x1xf32>
    %201 = arith.mulf %199, %200 : vector<8x1xf32>
    %cst_91 = arith.constant 9.99999974E-6 : f32
    %202 = vector.broadcast %cst_91 : f32 to vector<8x1xf32>
    %203 = arith.addf %201, %202 : vector<8x1xf32>
    %204 = math.rsqrt %203 : vector<8x1xf32>
    %205 = vector.broadcast %204 : vector<8x1xf32> to vector<8x256xf32>
    %206 = arith.mulf %190, %205 : vector<8x256xf32>
    %207 = vector.broadcast %3 : vector<8x1xf32> to vector<8x256xf32>
    %208 = arith.mulf %206, %207 : vector<8x256xf32>
    %209 = vector.broadcast %4 : vector<8x1xf32> to vector<8x256xf32>
    %210 = arith.addf %208, %209 : vector<8x256xf32>
    %cst_92 = arith.constant 0.000000e+00 : f32
    %211 = vector.broadcast %cst_92 : f32 to vector<8x256xf32>
    %212 = arith.maximumf %210, %211 : vector<8x256xf32>
    %c0_93 = arith.constant 0 : index
    %c0_94 = arith.constant 0 : index
    %213 = vector.load %arg9[%c0_93, %c0_94] : memref<8x256xf32, #tpu.memory_space<vmem>>, vector<8x256xf32>
    tpu.vector_store %arg9[%c0_93, %c0_94], %212 {strides = array<i32>} : memref<8x256xf32, #tpu.memory_space<vmem>>, vector<8x256xf32>,
    %c0_95 = arith.constant 0 : index
    %c0_96 = arith.constant 0 : index
    %214 = vector.load %arg5[%c0_95, %c0_96] : memref<8x8xbf16, #tpu.memory_space<vmem>>, vector<8x8xbf16>
    %c0_97 = arith.constant 0 : index
    %c0_98 = arith.constant 0 : index
    %215 = vector.load %arg9[%c0_97, %c0_98] : memref<8x256xf32, #tpu.memory_space<vmem>>, vector<8x256xf32>
    %216 = arith.truncf %215 : vector<8x256xf32> to vector<8x256xbf16>
    %cst_99 = arith.constant dense<0.000000e+00> : vector<8x256xf32>
    %217 = tpu.matmul %214, %216, %cst_99 {dimension_numbers = #tpu.dot_dimension_numbers<[1], [0], [0], [1], [0, 0, 1, 1], [], []>} : vector<8x8xbf16>, vector<8x256xbf16>, vector<8x256xf32> -> vector<8x256xf32>
    %218 = vector.broadcast %8 : vector<8x1xf32> to vector<8x256xf32>
    %219 = arith.addf %217, %218 : vector<8x256xf32>
    %cst_100 = arith.constant dense<0.000000e+00> : vector<8xf32>
    %220 = vector.multi_reduction <add>, %219, %cst_100 [1] : vector<8x256xf32> to vector<8xf32>
    %221 = vector.shape_cast %220 : vector<8xf32> to vector<8x1xf32>
    %222 = vector.shape_cast %221 : vector<8x1xf32> to vector<2x4x1xf32>
    %cst_101 = arith.constant dense<0.000000e+00> : vector<2x1xf32>
    %223 = vector.multi_reduction <add>, %222, %cst_101 [1] : vector<2x4x1xf32> to vector<2x1xf32>
    %224 = vector.shape_cast %223 : vector<2x1xf32> to vector<2x1x1xf32>
    %225 = vector.shape_cast %224 : vector<2x1x1xf32> to vector<2x1x1xf32>
    %226 = vector.broadcast %225 : vector<2x1x1xf32> to vector<2x4x1xf32>
    %227 = vector.shape_cast %226 : vector<2x4x1xf32> to vector<8x1xf32>
    %cst_102 = arith.constant 9.765625E-4 : f32
    %228 = vector.broadcast %cst_102 : f32 to vector<8x1xf32>
    %229 = arith.mulf %227, %228 : vector<8x1xf32>
    %230 = vector.broadcast %229 : vector<8x1xf32> to vector<8x256xf32>
    %231 = arith.subf %219, %230 : vector<8x256xf32>
    %232 = arith.mulf %231, %231 : vector<8x256xf32>
    %cst_103 = arith.constant dense<0.000000e+00> : vector<8xf32>
    %233 = vector.multi_reduction <add>, %232, %cst_103 [1] : vector<8x256xf32> to vector<8xf32>
    %234 = vector.shape_cast %233 : vector<8xf32> to vector<8x1xf32>
    %235 = vector.shape_cast %234 : vector<8x1xf32> to vector<2x4x1xf32>
    %cst_104 = arith.constant dense<0.000000e+00> : vector<2x1xf32>
    %236 = vector.multi_reduction <add>, %235, %cst_104 [1] : vector<2x4x1xf32> to vector<2x1xf32>
    %237 = vector.shape_cast %236 : vector<2x1xf32> to vector<2x1x1xf32>
    %238 = vector.shape_cast %237 : vector<2x1x1xf32> to vector<2x1x1xf32>
    %239 = vector.broadcast %238 : vector<2x1x1xf32> to vector<2x4x1xf32>
    %240 = vector.shape_cast %239 : vector<2x4x1xf32> to vector<8x1xf32>
    %cst_105 = arith.constant 9.765625E-4 : f32
    %241 = vector.broadcast %cst_105 : f32 to vector<8x1xf32>
    %242 = arith.mulf %240, %241 : vector<8x1xf32>
    %cst_106 = arith.constant 9.99999974E-6 : f32
    %243 = vector.broadcast %cst_106 : f32 to vector<8x1xf32>
    %244 = arith.addf %242, %243 : vector<8x1xf32>
    %245 = math.rsqrt %244 : vector<8x1xf32>
    %246 = vector.broadcast %245 : vector<8x1xf32> to vector<8x256xf32>
    %247 = arith.mulf %231, %246 : vector<8x256xf32>
    %248 = vector.broadcast %6 : vector<8x1xf32> to vector<8x256xf32>
    %249 = arith.mulf %247, %248 : vector<8x256xf32>
    %250 = vector.broadcast %7 : vector<8x1xf32> to vector<8x256xf32>
    %251 = arith.addf %249, %250 : vector<8x256xf32>
    %c0_107 = arith.constant 0 : index
    %c0_108 = arith.constant 0 : index
    %c0_109 = arith.constant 0 : index
    %252 = vector.load %arg7[%c0_107, %c0_108, %c0_109] : memref<1x8x256xf32, #tpu.memory_space<vmem>>, vector<1x8x256xf32>
    %253 = vector.shape_cast %252 : vector<1x8x256xf32> to vector<8x256xf32>
    %254 = vector.shape_cast %251 : vector<8x256xf32> to vector<1x8x256xf32>
    tpu.vector_store %arg7[%c0_107, %c0_108, %c0_109], %254 {strides = array<i32>} : memref<1x8x256xf32, #tpu.memory_space<vmem>>, vector<1x8x256xf32>,
    return
  }
  func.func @transform_0(%arg0: i32) -> (i32, i32, i32) {
    %c0_i32 = arith.constant 0 : i32
    %c0_i32_0 = arith.constant 0 : i32
    %c0_i32_1 = arith.constant 0 : i32
    return %arg0, %c0_i32, %c0_i32_0 : i32, i32, i32
  }
  func.func @transform_1(%arg0: i32) -> (i32, i32, i32) {
    %c0_i32 = arith.constant 0 : i32
    %c0_i32_0 = arith.constant 0 : i32
    %c0_i32_1 = arith.constant 0 : i32
    %c0_i32_2 = arith.constant 0 : i32
    return %c0_i32, %c0_i32_0, %c0_i32_1 : i32, i32, i32
  }
  func.func @transform_2(%arg0: i32) -> (i32, i32) {
    %c0_i32 = arith.constant 0 : i32
    %c0_i32_0 = arith.constant 0 : i32
    %c0_i32_1 = arith.constant 0 : i32
    return %c0_i32, %c0_i32_0 : i32, i32
  }
  func.func @transform_3(%arg0: i32) -> (i32, i32) {
    %c0_i32 = arith.constant 0 : i32
    %c0_i32_0 = arith.constant 0 : i32
    %c0_i32_1 = arith.constant 0 : i32
    return %c0_i32, %c0_i32_0 : i32, i32
  }
  func.func @transform_4(%arg0: i32) -> (i32, i32) {
    %c0_i32 = arith.constant 0 : i32
    %c0_i32_0 = arith.constant 0 : i32
    %c0_i32_1 = arith.constant 0 : i32
    return %c0_i32, %c0_i32_0 : i32, i32
  }
  func.func @transform_5(%arg0: i32) -> (i32, i32) {
    %c0_i32 = arith.constant 0 : i32
    %c0_i32_0 = arith.constant 0 : i32
    %c0_i32_1 = arith.constant 0 : i32
    return %c0_i32, %c0_i32_0 : i32, i32
  }
  func.func @transform_6(%arg0: i32) -> (i32, i32, i32) {
    %c0_i32 = arith.constant 0 : i32
    %c0_i32_0 = arith.constant 0 : i32
    %c0_i32_1 = arith.constant 0 : i32
    return %arg0, %c0_i32, %c0_i32_0 : i32, i32, i32
  }
}

</mosaic_0001>

<bundles_post_ra>
// kernel: tpu_custom_call.1
= control target key start
LH: loop header
LB: loop body
LE: loop exit
PB: predicated region body
PF: predicated region fallthrough
CT: control target
= control target key end

     0   :  { %11 = vsyncpa [#allocation5], 0  ;;  %s2022_s0 = inlined_call_operand.hbm [shape: f32[2,8,256], index: 0, kind: input, shape index: {}]   ;;  %s2023_s1 = inlined_call_operand.hbm [shape: f32[25,8,256], index: 1, kind: input, shape index: {}]   ;;  %s2024_s2 = inlined_call_operand.vmem [shape: f32[8,6], index: 2, kind: input, shape index: {}]   ;;  %s2025_s3 = inlined_call_operand.vmem [shape: bf16[8,8], index: 3, kind: input, shape index: {}]   ;;  %s2026_s4 = inlined_call_operand.vmem [shape: bf16[8,8], index: 4, kind: input, shape index: {}]   ;;  %s2027_s5 = inlined_call_operand.vmem [shape: f32[8,3], index: 5, kind: input, shape index: {}]   ;;  %s2028_s6 = inlined_call_operand.hbm [shape: f32[2,8,256], index: 6, kind: output, shape index: {}]  }
   0x1   :  { %13 = vsyncpa [#allocation5 + $0x1], 0 }
   0x2   :  { %14 = vsyncpa [#allocation8], 0 }
   0x3   :  { %15 = vsyncpa [#allocation6], 0 }
   0x4   :  { %17 = vsyncpa [#allocation6 + $0x1], 0  ;;  %s1522_s21 = smov 0   ;;  %s1524_s22 = smov 0  }
   0x5   :  { %s1526_s23 = smov 0   ;;  %s1528_s24 = smov 0  }
   0x6 LB: > { %s1543_s25 = sadd.s32 4294967295, %s1448_s24   ;;  %s1185_s26 = sadd.s32 4294967294, %s1448_s24   ;;  %s1448_s24 = sphi %s1528_s24, %s2048_s24   ;;  %s1444_s23 = sphi %s1526_s23, %s2047_s23   ;;  %s1440_s22 = sphi %s1524_s22, %s2046_s22   ;;  %s1436_s21 = sphi %s1522_s21, %s2045_s21  }
   0x7   : > { %p43_p0 = scmp.ne.s32.totalorder %s1440_s22, %s1436_s21  ;;  %p2029_p1 = scmp.eq.s32.totalorder %s1543_s25, 0 }
   0x8   : > { %p178_p3 = scmp.eq.s32.totalorder %s1185_s26, 1  ;;  %p1186_p5 = scmp.ge.s32.totalorder %s1448_s24, 1 }
   0x9   : > { %p1552_p4 = por %p2029_p1, %p43_p0  ;;  %p185_p7 = scmp.lt.s32.totalorder %s1448_s24, 3 }
   0xa   : > { %p1557_p6 = por %p178_p3, %p43_p0  ;;  %s1450_s30 = smov [#allocation7]  }
   0xb   : > { %s2032_s27 = scalar_select %p1552_p4, 1, 0 }
   0xc   : > { %s2033_s28 = scalar_select %p1557_p6, 1, 0 }
   0xd   : > { %p1562_p8 = pnand %p1186_p5, %p185_p7  ;;  %s197_s7 = sshll.u32 %s1450_s30, 4  ;;  %s1566_s7 = int_to_ptr.vmem [resolvable:$true] %s197_s7 }
   0xe   : > { %s1578_s9 = sadd.s32 1, %s1448_s24   ;;  %s30_s10 = sadd.s32 1, %s1444_s23 }
   0xf   : > { %s2034_s29 = scalar_select %p1562_p8, 1, 0 }
  0x10   : > { %p1215_p9 = pneg %p1562_p8  ;;  %s27_s11 = ssub.s32 %s1448_s24, %s1578_s9 }
  0x11   : > { %s1320_s14 = scalar_lea.hbm %s2023_s1, 6400 }
  0x12   : > { %p1573_p11 = pnand %p1215_p9, %p2029_p1  ;;  %p1321_p12 = scmp.ne.s32.totalorder %s2023_s1, %s1320_s14 }
  0x13   : > { %p1327_p5 = scmp.lt.u32.totalorder %s1320_s14, %s2023_s1 }
  0x14   : > { %p1322_p13 = pneg %p1573_p11 }
  0x16   : > { %p1323_p0 = pnand %p1322_p13, %p1321_p12 }
  0x18   : > { %p1324_p3 = pneg %p1323_p0 }
  0x1a   : > { %p1329_p7 = pnand %p1327_p5, %p1324_p3 }
  0x1c   : > { %1332 = shalt.err (!%p1329_p7)
}
  0x1d   : > { %s1333_s19 = scalar_lea.vmem %s1566_s7, 6400  ;;  %p1341_p2 = scmp.lt.s32.totalorder %s1566_s7, %s1566_s7 }
  0x1e   : > { %p1334_p9 = scmp.ne.s32.totalorder %s1566_s7, %s1333_s19  ;;  %p1342_p6 = scmp.lt.s32.totalorder %s1333_s19, %s1333_s19 }
  0x20   : > { %p1336_p10 = pnand %p1334_p9, %p1322_p13  ;;  %p1343_p4 = por %p1342_p6, %p1341_p2 }
  0x22   : > { %p1337_p1 = pneg %p1336_p10 }
  0x24   : > { %p1344_p8 = pnand %p1343_p4, %p1337_p1 }
  0x26   : > { %1347 = shalt.err (!%p1344_p8)
}
  0x27   : > { %s1451_s20 = smov 256   ;;  %s1452_s26 = smov 16  }
  0x28   : > { %1218 = dma.hbm_to_vmem [thread:$0]  (!%p1573_p11), %s2023_s1, 6400, %s1566_s7, [#allocation8], %s1451_s20, %s1451_s20, %s1452_s26  }
  0x29   : > { %p28_p2 = scmp.eq.s32.totalorder %s27_s11, 0  ;;  %p37_p1 = scmp.ne.s32.totalorder %s1444_s23, %s1440_s22 }
  0x2a   : > { %p38_p4 = scmp.eq.s32.totalorder %s1448_s24, 0  ;;  %p1228_p6 = scmp.lt.s32.totalorder %s1448_s24, 2 }
  0x2b   : > { %s1609_s13 = scalar_select %p28_p2, %s1444_s23, %s30_s10  }
  0x2c   : > { %p39_p8 = por %p38_p4, %p37_p1  ;;  %p2036_p10 = scmp.eq.s32.totalorder %s1543_s25, 1 }
  0x2d   : > { %s223_s15 = sand.u32 1, %s1444_s23   ;;  %s1205_s16 = sshll.u32 %s1448_s24, 8 }
  0x2e   : > { %p1613_p12 = por %p2036_p10, %p37_p1  ;;  %s1189_s17 = sshll.u32 %s223_s15, 4 }
  0x2f   : > { %s1622_s19 = scalar_lea.hbm %s2022_s0, %s1205_s16  ;;  %s227_s7 = scalar_lea.vmem [#allocation4], %s1189_s17 }
  0x30   : > { %s235_s10 = sshll.u32 %s227_s7, 4  ;;  %p1624_p11 = pnand %p1228_p6, %p39_p8  ;;  %s1628_s10 = int_to_ptr.vmem [resolvable:$true] %s235_s10 }
  0x31   : > { %s224_s20 = scalar_lea.sflag [#allocation5], %s223_s15  ;;  %s1348_s26 = scalar_lea.hbm %s1622_s19, 256 }
  0x32   : > { %p1349_p13 = scmp.ne.s32.totalorder %s1622_s19, %s1348_s26  ;;  %p1350_p0 = pneg %p1624_p11 }
  0x33   : > { %s1353_s16 = scalar_lea.hbm %s2022_s0, 512  ;;  %p1354_p7 = scmp.lt.u32.totalorder %s1622_s19, %s2022_s0 }
  0x34   : > { %p1351_p3 = pnand %p1350_p0, %p1349_p13  ;;  %p1355_p9 = scmp.lt.u32.totalorder %s1353_s16, %s1348_s26 }
  0x35   : > { %p1357_p1 = scmp.lt.u32.totalorder %s1348_s26, %s1622_s19 }
  0x36   : > { %p1352_p5 = pneg %p1351_p3  ;;  %p1356_p2 = por %p1355_p9, %p1354_p7 }
  0x38   : > { %p1358_p4 = por %p1357_p1, %p1356_p2 }
  0x3a   : > { %p1359_p6 = pnand %p1358_p4, %p1352_p5 }
  0x3c   : > { %1362 = shalt.err (!%p1359_p6)
}
  0x3d   : > { %s1363_s15 = scalar_lea.vmem %s1628_s10, 256  ;;  %s1453_s18 = smov [#allocation4]  }
  0x3e   : > { %p1364_p8 = scmp.ne.s32.totalorder %s1628_s10, %s1363_s15  ;;  %s1368_s7 = sshll.u32 %s1453_s18, 4  ;;  %s1369_s7 = int_to_ptr.vmem [resolvable:$false] %s1368_s7 }
  0x3f   : > { %s1370_s30 = scalar_lea.vmem %s1369_s7, 512  ;;  %p1371_p3 = scmp.lt.s32.totalorder %s1628_s10, %s1369_s7 }
  0x40   : > { %p1366_p10 = pnand %p1364_p8, %p1350_p0  ;;  %p1372_p7 = scmp.lt.s32.totalorder %s1370_s30, %s1363_s15 }
  0x42   : > { %p1367_p13 = pneg %p1366_p10  ;;  %p1373_p9 = por %p1372_p7, %p1371_p3 }
  0x44   : > { %p1374_p2 = pnand %p1373_p9, %p1367_p13 }
  0x46   : > { %1377 = shalt.err (!%p1374_p2)
}
  0x47   : > { %1222 = dma.hbm_to_vmem [thread:$0]  (!%p1624_p11), %s1622_s19, 256, %s1628_s10, %s224_s20  }
  0x48   : > { %p2039_p5 = scmp.ne.s32.totalorder %s2034_s29, 0 }
  0x49   : > { %s1658_s26 = sand.u32 (!%p2039_p5), 1, %s1440_s22   ;;  %p2040_p0 = scmp.ne.s32.totalorder (!%p2039_p5), %s2032_s27, 0 }
  0x4a   : > { %244 = sbr.rel (%p2039_p5) target bundleno = 1828 (0x724), region = 44  ;;  %s1193_s12 = sshll.u32 (!%p2039_p5), %s1658_s26, 4 }
  0x4b   : > { %s247_s16 = scalar_lea.sflag (!%p2039_p5), [#allocation5], %s1658_s26  ;;  %s250_s17 = scalar_lea.vmem (!%p2039_p5), [#allocation4], %s1193_s12 }
  0x51   : > { %1423 = dma.done.wait (%p2040_p0), %s247_s16, 256  }
  0x52   : > { %1425 = vsyncadd (%p2040_p0), %s247_s16, 4294967040  ;;  %p2041_p11 = scmp.eq.s32.totalorder %s1543_s25, 0 }
  0x54   : > { %1427 = dma.done.wait (%p2041_p11), [#allocation8], 6400   ;;  %p2042_p1 = pmov %p2041_p11 }
  0x55   : > { %v1454_v0 = vmov 0   ;;  %v1678_v1 = vld [vmem:[%s2024_s2] sm:$0xff]  ;;  %v1680_v2 = vld [vmem:[%s250_s17 + $0x8] sm:$0xff]  ;;  %s1455_s27 = smov 34   ;;  %s1456_s10 = smov 33   ;;  %v299_v23 = vlaneseq  ;;  %v318_v35 = vld [vmem:[#allocation7 + $0x10] sm:$0xff] }
  0x56   : > { %1429 = vsyncadd (%p2042_p1), [#allocation8], 4294960896  ;;  %1298 = vset.pattern.permute.xlu0 %v1454_v0  ;;  %801 = vmatprep.mubr.bf16.mxu0 %v1454_v0  ;;  %v1684_v3 = vld [vmem:[%s250_s17] sm:$0xff]  ;;  %s1457_s11 = smov 32   ;;  %s1458_s20 = smov 31   ;;  %v305_v32 = vld [vmem:[#allocation7 + $0x8] sm:$0xff] }
  0x57   : > { %973 = vmatprep.mubr.bf16.mxu1 %v1454_v0  ;;  %290 = vperm.xlu0 %1298, %v1678_v1   ;;  %s1459_s8 = smov 30   ;;  %s1460_s15 = smov 18   ;;  %v1752_v26 = vand.u32 127, %v299_v23  ;;  %v304_v31 = vld [vmem:[#allocation7] sm:$0xff]  ;;  %v319_v36 = vld [vmem:[#allocation7 + $0x18] sm:$0xff]  ;;  %v333_v44 = vld [vmem:[#allocation7 + $0x28] sm:$0xff] }
  0x58   : > { %297 = vrot.lane.b32.xlu1 %v1680_v2, %s1455_s27  ;;  %s1461_s18 = smov 17   ;;  %s1462_s7 = smov 16   ;;  %v332_v43 = vld [vmem:[#allocation7 + $0x20] sm:$0xff]  ;;  %v346_v51 = vld [vmem:[#allocation7 + $0x30] sm:$0xff]  ;;  %v347_v52 = vld [vmem:[#allocation7 + $0x38] sm:$0xff] }
  0x59   : > { %s1463_s30 = smov 15   ;;  %s1464_s16 = smov 14   ;;  %vm301_vm0 = vcmp.lt.s32.totalorder %v1752_v26, 34  ;;  %vm314_vm1 = vcmp.lt.s32.totalorder %v1752_v26, 33  ;;  %vm328_vm2 = vcmp.lt.s32.totalorder %v1752_v26, 32  ;;  %vm342_vm3 = vcmp.lt.s32.totalorder %v1752_v26, 31 }
  0x5a   : > { %s1465_s17 = smov 2   ;;  %s1466_s29 = smov 1   ;;  %vm356_vm4 = vcmp.lt.s32.totalorder %v1752_v26, 30  ;;  %vm370_vm5 = vcmp.lt.s32.totalorder %v1752_v26, 18  ;;  %v360_v61 = vld [vmem:[#allocation7 + $0x40] sm:$0xff]  ;;  %v361_v62 = vld [vmem:[#allocation7 + $0x48] sm:$0xff] }
  0x5b   : > { %295 = vrot.lane.b32.xlu0 %v1684_v3, %s1455_s27  ;;  %s1467_s19 = smov 127   ;;  %s1468_s27 = smov 126   ;;  %vm384_vm6 = vcmp.lt.s32.totalorder %v1752_v26, 17  ;;  %vm398_vm7 = vcmp.lt.s32.totalorder %v1752_v26, 16  ;;  %vm412_vm8 = vcmp.lt.s32.totalorder %v1752_v26, 15  ;;  %vm426_vm9 = vcmp.lt.s32.totalorder %v1752_v26, 14 }
  0x5c   : > { %310 = vrot.lane.b32.xlu1 %v1684_v3, %s1456_s10  ;;  %vm440_vm10 = vcmp.lt.s32.totalorder %v1752_v26, 2  ;;  %vm454_vm11 = vcmp.lt.s32.totalorder %v1752_v26, 1  ;;  %vm475_vm12 = vcmp.lt.s32.totalorder %v1752_v26, 127  ;;  %vm489_vm13 = vcmp.lt.s32.totalorder %v1752_v26, 126 }
  0x5d   : > { %vm503_vm14 = vcmp.lt.s32.totalorder %v1752_v26, 114  ;;  %vm517_vm15 = vcmp.lt.s32.totalorder %v1752_v26, 113 }
  0x5f   : > { %312 = vrot.lane.b32.xlu0 %v1680_v2, %s1456_s10  ;;  %s1469_s10 = smov 114  }
  0x60   : > { %324 = vrot.lane.b32.xlu1 %v1684_v3, %s1457_s11 }
  0x63   : > { %326 = vrot.lane.b32.xlu0 %v1680_v2, %s1457_s11  ;;  %s1470_s11 = smov 113  }
  0x64   : > { %338 = vrot.lane.b32.xlu1 %v1684_v3, %s1458_s20 }
  0x67   : > { %340 = vrot.lane.b32.xlu0 %v1680_v2, %s1458_s20  ;;  %s1471_s20 = smov 112  }
  0x68   : > { %352 = vrot.lane.b32.xlu1 %v1684_v3, %s1459_s8 }
  0x6b   : > { %354 = vrot.lane.b32.xlu0 %v1680_v2, %s1459_s8  ;;  %s1472_s8 = smov 111  }
  0x6c   : > { %366 = vrot.lane.b32.xlu1 %v1684_v3, %s1460_s15 }
  0x6f   : > { %368 = vrot.lane.b32.xlu0 %v1680_v2, %s1460_s15  ;;  %s1473_s15 = smov 110  }
  0x70   : > { %380 = vrot.lane.b32.xlu1 %v1684_v3, %s1461_s18 }
  0x73   : > { %382 = vrot.lane.b32.xlu0 %v1680_v2, %s1461_s18  ;;  %s1474_s18 = smov 98  }
  0x74   : > { %394 = vrot.lane.b32.xlu1 %v1684_v3, %s1462_s7 }
  0x77   : > { %396 = vrot.lane.b32.xlu0 %v1680_v2, %s1462_s7  ;;  %s1475_s7 = smov 97  }
  0x78   : > { %408 = vrot.lane.b32.xlu1 %v1684_v3, %s1463_s30 }
  0x7b   : > { %410 = vrot.lane.b32.xlu0 %v1680_v2, %s1463_s30  ;;  %s1476_s30 = smov 96  }
  0x7c   : > { %422 = vrot.lane.b32.xlu1 %v1684_v3, %s1464_s16 }
  0x7f   : > { %424 = vrot.lane.b32.xlu0 %v1680_v2, %s1464_s16  ;;  %s1477_s16 = smov 95  }
  0x80   : > { %436 = vrot.lane.b32.xlu1 %v1684_v3, %s1465_s17 }
  0x83   : > { %438 = vrot.lane.b32.xlu0 %v1680_v2, %s1465_s17  ;;  %s1478_s17 = smov 94  }
  0x84   : > { %450 = vrot.lane.b32.xlu1 %v1684_v3, %s1466_s29 }
  0x87   : > { %452 = vrot.lane.b32.xlu0 %v1680_v2, %s1466_s29 }
  0x88   : > { %471 = vrot.lane.b32.xlu1 %v1684_v3, %s1467_s19 }
  0x8b   : > { %473 = vrot.lane.b32.xlu0 %v1680_v2, %s1467_s19 }
  0x8c   : > { %485 = vrot.lane.b32.xlu1 %v1684_v3, %s1468_s27 }
  0x8f   : > { %487 = vrot.lane.b32.xlu0 %v1680_v2, %s1468_s27 }
  0x90   : > { %499 = vrot.lane.b32.xlu1 %v1684_v3, %s1469_s10 }
  0x93   : > { %501 = vrot.lane.b32.xlu0 %v1680_v2, %s1469_s10 }
  0x94   : > { %513 = vrot.lane.b32.xlu1 %v1684_v3, %s1470_s11 }
  0x97   : > { %515 = vrot.lane.b32.xlu0 %v1680_v2, %s1470_s11 }
  0x98   : > { %527 = vrot.lane.b32.xlu1 %v1684_v3, %s1471_s20 }
  0x9b   : > { %529 = vrot.lane.b32.xlu0 %v1680_v2, %s1471_s20 }
  0x9c   : > { %541 = vrot.lane.b32.xlu1 %v1684_v3, %s1472_s8 }
  0x9f   : > { %543 = vrot.lane.b32.xlu0 %v1680_v2, %s1472_s8  ;;  %s1206_s8 = sshll.u32 %s1543_s25, 8  ;;  %s1091_s25 = scalar_lea.sflag [#allocation6], %s1658_s26 }
  0xa0   : > { %555 = vrot.lane.b32.xlu1 %v1684_v3, %s1473_s15 }
  0xa3   : > { %557 = vrot.lane.b32.xlu0 %v1680_v2, %s1473_s15  ;;  %s282_s15 = scalar_lea.vmem [#allocation9], %s1193_s12  ;;  %s1486_s12 = smov [#allocation9]  }
  0xa4   : > { %569 = vrot.lane.b32.xlu1 %v1684_v3, %s1474_s18  ;;  %s1382_s29 = sshll.u32 %s1486_s12, 4  ;;  %s1383_s29 = int_to_ptr.vmem [resolvable:$false] %s1382_s29 }
  0xa5   : > { %s1384_s19 = scalar_lea.vmem %s1383_s29, 512 }
  0xa7   : > { %571 = vrot.lane.b32.xlu0 %v1680_v2, %s1474_s18  ;;  %s1105_s18 = sshll.u32 %s282_s15, 4  ;;  %s1980_s18 = int_to_ptr.vmem [resolvable:$true] %s1105_s18 }
  0xa8   : > { %583 = vrot.lane.b32.xlu1 %v1684_v3, %s1475_s7  ;;  %p1385_p10 = scmp.lt.s32.totalorder %s1980_s18, %s1383_s29 }
  0xab   : > { %585 = vrot.lane.b32.xlu0 %v1680_v2, %s1475_s7 }
  0xac   : > { %597 = vrot.lane.b32.xlu1 %v1684_v3, %s1476_s30 }
  0xaf   : > { %599 = vrot.lane.b32.xlu0 %v1680_v2, %s1476_s30 }
  0xb0   : > { %611 = vrot.lane.b32.xlu1 %v1684_v3, %s1477_s16 }
  0xb3   : > { %613 = vrot.lane.b32.xlu0 %v1680_v2, %s1477_s16  ;;  %s1978_s16 = scalar_lea.hbm %s2028_s6, %s1206_s8 }
  0xb4   : > { %625 = vrot.lane.b32.xlu1 %v1684_v3, %s1478_s17 }
  0xb7   : > { %627 = vrot.lane.b32.xlu0 %v1680_v2, %s1478_s17  ;;  %s1378_s17 = scalar_lea.vmem %s1980_s18, 256 }
  0xb8   : > { %p1379_p4 = scmp.ne.s32.totalorder %s1980_s18, %s1378_s17  ;;  %p1386_p13 = scmp.lt.s32.totalorder %s1384_s19, %s1378_s17 }
  0xba   : > { %p1380_p6 = pnand %p1379_p4, %p1613_p12  ;;  %p1387_p3 = por %p1386_p13, %p1385_p10 }
  0xbc   : > { %p1381_p8 = pneg %p1380_p6 }
  0xbe   : > { %p1388_p7 = pnand %p1387_p3, %p1381_p8 }
  0xca   : > { %v298_v4 = vpop.permute.xlu1 %297 }
  0xce   : > { %v311_v5 = vpop.permute.xlu1 %310 }
  0xd2   : > { %v325_v6 = vpop.permute.xlu1 %324 }
  0xd6   : > { %v339_v7 = vpop.permute.xlu1 %338  ;;  %v291_v8 = vpop.permute.xlu0 %290 }
  0xd7   : > { %v293_v47 = vadd.f32 %v291_v8, %v1684_v3  ;;  %v294_v48 = vadd.f32 %v291_v8, %v1680_v2 }
  0xda   : > { %v353_v9 = vpop.permute.xlu1 %352  ;;  %v296_v10 = vpop.permute.xlu0 %295 }
  0xdb   : > { %v302_v33 = vsel %vm301_vm0, %v296_v10, %v298_v4  ;;  %v303_v34 = vsel %vm301_vm0, %v298_v4, %v296_v10  ;;  %v374_v10 = vld [vmem:[#allocation7 + $0x50] sm:$0xff]  ;;  %vm531_vm0 = vcmp.lt.s32.totalorder %v1752_v26, 112 }
  0xdc   : > { %v306_v40 = vmul.f32 %v304_v31, %v303_v34  ;;  %v307_v41 = vmul.f32 %v305_v32, %v302_v33 }
  0xde   : > { %v1733_v11 = vpop.permute.xlu1 %366  ;;  %v313_v12 = vpop.permute.xlu0 %312  ;;  %v308_v56 = vadd.f32 %v306_v40, %v293_v47  ;;  %v309_v57 = vadd.f32 %v307_v41, %v294_v48 }
  0xdf   : > { %v315_v37 = vsel %vm314_vm1, %v311_v5, %v313_v12  ;;  %v316_v38 = vsel %vm314_vm1, %v313_v12, %v311_v5  ;;  %v375_v12 = vld [vmem:[#allocation7 + $0x58] sm:$0xff]  ;;  %vm545_vm1 = vcmp.lt.s32.totalorder %v1752_v26, 111 }
  0xe0   : > { %v320_v49 = vmul.f32 %v318_v35, %v316_v38  ;;  %v321_v50 = vmul.f32 %v319_v36, %v315_v37  ;;  %v388_v35 = vld [vmem:[#allocation7 + $0x60] sm:$0xff]  ;;  %v389_v36 = vld [vmem:[#allocation7 + $0x68] sm:$0xff] }
  0xe2   : > { %v1735_v13 = vpop.permute.xlu1 %380  ;;  %v327_v14 = vpop.permute.xlu0 %326  ;;  %v322_v5 = vadd.f32 %v320_v49, %v308_v56 }
  0xe3   : > { %v329_v45 = vsel %vm328_vm2, %v325_v6, %v327_v14  ;;  %v330_v46 = vsel %vm328_vm2, %v327_v14, %v325_v6  ;;  %v323_v6 = vadd.f32 %v321_v50, %v309_v57  ;;  %v416_v50 = vld [vmem:[#allocation7 + $0x80] sm:$0xff]  ;;  %vm559_vm2 = vcmp.lt.s32.totalorder %v1752_v26, 110 }
  0xe4   : > { %v334_v58 = vmul.f32 %v332_v43, %v330_v46  ;;  %v335_v59 = vmul.f32 %v333_v44, %v329_v45  ;;  %v402_v43 = vld [vmem:[#allocation7 + $0x70] sm:$0xff]  ;;  %v403_v44 = vld [vmem:[#allocation7 + $0x78] sm:$0xff] }
  0xe6   : > { %v1737_v15 = vpop.permute.xlu1 %394  ;;  %v341_v16 = vpop.permute.xlu0 %340  ;;  %v336_v31 = vadd.f32 %v334_v58, %v322_v5  ;;  %v430_v58 = vld [vmem:[#allocation7 + $0x90] sm:$0xff] }
  0xe7   : > { %v343_v53 = vsel %vm342_vm3, %v339_v7, %v341_v16  ;;  %v344_v54 = vsel %vm342_vm3, %v341_v16, %v339_v7  ;;  %vm573_vm3 = vcmp.lt.s32.totalorder %v1752_v26, 98 }
  0xe8   : > { %v348_v7 = vmul.f32 %v346_v51, %v344_v54  ;;  %v349_v8 = vmul.f32 %v347_v52, %v343_v53  ;;  %v417_v51 = vld [vmem:[#allocation7 + $0x88] sm:$0xff] }
  0xea   : > { %v1739_v17 = vpop.permute.xlu1 %408  ;;  %v355_v18 = vpop.permute.xlu0 %354 }
  0xeb   : > { %v357_v63 = vsel %vm356_vm4, %v353_v9, %v355_v18  ;;  %v358_v4 = vsel %vm356_vm4, %v355_v18, %v353_v9  ;;  %v337_v9 = vadd.f32 %v335_v59, %v323_v6  ;;  %v431_v59 = vld [vmem:[#allocation7 + $0x98] sm:$0xff]  ;;  %v444_v6 = vld [vmem:[#allocation7 + $0xa0] sm:$0xff]  ;;  %vm587_vm4 = vcmp.lt.s32.totalorder %v1752_v26, 97 }
  0xec   : > { %v362_v18 = vmul.f32 %v360_v61, %v358_v4  ;;  %v363_v32 = vmul.f32 %v361_v62, %v357_v63 }
  0xed   : > { %v351_v38 = vadd.f32 %v349_v8, %v337_v9 }
  0xee   : > { %v1741_v19 = vpop.permute.xlu1 %422  ;;  %v369_v20 = vpop.permute.xlu0 %368 }
  0xef   : > { %v371_v14 = vsel %vm370_vm5, %v1733_v11, %v369_v20  ;;  %v372_v16 = vsel %vm370_vm5, %v369_v20, %v1733_v11  ;;  %v350_v20 = vadd.f32 %v348_v7, %v336_v31  ;;  %v445_v7 = vld [vmem:[#allocation7 + $0xa8] sm:$0xff]  ;;  %v459_v31 = vld [vmem:[#allocation7 + $0xb8] sm:$0xff]  ;;  %vm601_vm5 = vcmp.lt.s32.totalorder %v1752_v26, 96 }
  0xf0   : > { %v376_v40 = vmul.f32 %v374_v10, %v372_v16  ;;  %v377_v41 = vmul.f32 %v375_v12, %v371_v14  ;;  %v458_v16 = vld [vmem:[#allocation7 + $0xb0] sm:$0xff] }
  0xf2   : > { %v1743_v21 = vpop.permute.xlu1 %436  ;;  %v1745_v22 = vpop.permute.xlu0 %382 }
  0xf3   : > { %v385_v37 = vsel %vm384_vm6, %v1735_v13, %v1745_v22  ;;  %v386_v11 = vsel %vm384_vm6, %v1745_v22, %v1735_v13  ;;  %v364_v13 = vadd.f32 %v362_v18, %v350_v20  ;;  %v365_v22 = vadd.f32 %v363_v32, %v351_v38 }
  0xf4   : > { %v390_v47 = vmul.f32 %v388_v35, %v386_v11  ;;  %v391_v48 = vmul.f32 %v389_v36, %v385_v37  ;;  %vm615_vm6 = vcmp.lt.s32.totalorder %v1752_v26, 95 }
  0xf5   : > { %v379_v53 = vadd.f32 %v377_v41, %v365_v22  ;;  %v465_v41 = vld [vmem:[#allocation7 + $0xc0] sm:$0xff] }
  0xf6   : > { %v1747_v24 = vpop.permute.xlu1 %450  ;;  %v1749_v25 = vpop.permute.xlu0 %396 }
  0xf7   : > { %v399_v45 = vsel %vm398_vm7, %v1737_v15, %v1749_v25  ;;  %v400_v46 = vsel %vm398_vm7, %v1749_v25, %v1737_v15  ;;  %v378_v25 = vadd.f32 %v376_v40, %v364_v13  ;;  %v393_v62 = vadd.f32 %v391_v48, %v379_v53  ;;  %v479_v48 = vld [vmem:[#allocation7 + $0xd0] sm:$0xff] }
  0xf8   : > { %v404_v54 = vmul.f32 %v402_v43, %v400_v46  ;;  %v405_v56 = vmul.f32 %v403_v44, %v399_v45  ;;  %v466_v43 = vld [vmem:[#allocation7 + $0xc8] sm:$0xff]  ;;  %vm629_vm7 = vcmp.lt.s32.totalorder %v1752_v26, 94  ;;  %v1479_v26 = vmov 1  }
  0xf9   : > { %v468_v22 = vmul.f32 %v466_v43, %v1680_v2  ;;  %1299 = vset.pattern.permute.xlu0 %v1479_v26 }
  0xfa   : > { %v1754_v27 = vpop.permute.xlu1 %471  ;;  %v1756_v28 = vpop.permute.xlu0 %410 }
  0xfb   : > { %v413_v52 = vsel %vm412_vm8, %v1739_v17, %v1756_v28  ;;  %v414_v15 = vsel %vm412_vm8, %v1756_v28, %v1739_v17  ;;  %v392_v28 = vadd.f32 %v390_v47, %v378_v25  ;;  %v494_v25 = vld [vmem:[#allocation7 + $0xe8] sm:$0xff]  ;;  %vm659_vm8 = vcmask 1043456  }
  0xfc   : > { %v418_v63 = vmul.f32 %v416_v50, %v414_v15  ;;  %v419_v4 = vmul.f32 %v417_v51, %v413_v52  ;;  %v480_v50 = vld [vmem:[#allocation7 + $0xd8] sm:$0xff] }
  0xfe   : > { %v1759_v29 = vpop.permute.xlu1 %485  ;;  %v1762_v30 = vpop.permute.xlu0 %424 }
  0xff   : > { %v427_v61 = vsel %vm426_vm9, %v1741_v19, %v1762_v30  ;;  %v428_v17 = vsel %vm426_vm9, %v1762_v30, %v1741_v19  ;;  %v406_v19 = vadd.f32 %v404_v54, %v392_v28  ;;  %v407_v30 = vadd.f32 %v405_v56, %v393_v62 }
 0x100   : > { %v432_v12 = vmul.f32 %v430_v58, %v428_v17  ;;  %v433_v14 = vmul.f32 %v431_v59, %v427_v61  ;;  %v507_v61 = vld [vmem:[#allocation7 + $0xf0] sm:$0xff]  ;;  %v508_v17 = vld [vmem:[#allocation7 + $0xf8] sm:$0xff]  ;;  %vm759_vm9 = vcmask 64512  }
 0x101   : > { %v420_v32 = vadd.f32 %v418_v63, %v406_v19  ;;  %v421_v35 = vadd.f32 %v419_v4, %v407_v30  ;;  %v535_v19 = vld [vmem:[#allocation7 + $0x110] sm:$0xff]  ;;  %v536_v30 = vld [vmem:[#allocation7 + $0x118] sm:$0xff] }
 0x102   : > { %v1765_v39 = vpop.permute.xlu1 %499  ;;  %v1768_v42 = vpop.permute.xlu0 %438 }
 0x103   : > { %v441_v8 = vsel %vm440_vm10, %v1743_v21, %v1768_v42  ;;  %v442_v10 = vsel %vm440_vm10, %v1768_v42, %v1743_v21  ;;  %v434_v11 = vadd.f32 %v432_v12, %v420_v32  ;;  %v435_v20 = vadd.f32 %v433_v14, %v421_v35  ;;  %v550_v35 = vld [vmem:[#allocation7 + $0x128] sm:$0xff] }
 0x104   : > { %v446_v36 = vmul.f32 %v444_v6, %v442_v10  ;;  %v447_v21 = vmul.f32 %v445_v7, %v441_v8  ;;  %v521_v6 = vld [vmem:[#allocation7 + $0x100] sm:$0xff] }
 0x106   : > { %v1774_v55 = vpop.permute.xlu1 %513  ;;  %v1776_v60 = vpop.permute.xlu0 %452  ;;  %v448_v44 = vadd.f32 %v446_v36, %v434_v11  ;;  %v449_v45 = vadd.f32 %v447_v21, %v435_v20 }
 0x107   : > { %v455_v9 = vsel %vm454_vm11, %v1747_v24, %v1776_v60  ;;  %v456_v18 = vsel %vm454_vm11, %v1776_v60, %v1747_v24  ;;  %v467_v24 = vmul.f32 %v465_v41, %v1684_v3  ;;  %v493_v3 = vld [vmem:[#allocation7 + $0xe0] sm:$0xff]  ;;  %v564_v41 = vld [vmem:[#allocation7 + $0x138] sm:$0xff] }
 0x108   : > { %v460_v38 = vmul.f32 %v458_v16, %v456_v18  ;;  %v461_v40 = vmul.f32 %v459_v31, %v455_v9 }
 0x10a   : > { %v1790_v33 = vpop.permute.xlu0 %473  ;;  %v1792_v34 = vpop.permute.xlu1 %527  ;;  %v462_v60 = vadd.f32 %v460_v38, %v448_v44  ;;  %v463_v13 = vadd.f32 %v461_v40, %v449_v45  ;;  %v563_v40 = vld [vmem:[#allocation7 + $0x130] sm:$0xff] }
 0x10b   : > { %v476_v51 = vsel %vm475_vm12, %v1754_v27, %v1790_v33  ;;  %v477_v52 = vsel %vm475_vm12, %v1790_v33, %v1754_v27 }
 0x10c   : > { %v469_v54 = vadd.f32 %v467_v24, %v462_v60  ;;  %v470_v56 = vadd.f32 %v468_v22, %v463_v13  ;;  %v481_v58 = vmul.f32 %v479_v48, %v476_v51  ;;  %v482_v59 = vmul.f32 %v480_v50, %v477_v52  ;;  %v577_v13 = vld [vmem:[#allocation7 + $0x140] sm:$0xff]  ;;  %v578_v22 = vld [vmem:[#allocation7 + $0x148] sm:$0xff] }
 0x10e   : > { %v1812_v49 = vpop.permute.xlu0 %487  ;;  %v1823_v57 = vpop.permute.xlu1 %541  ;;  %v483_v8 = vadd.f32 %v481_v58, %v469_v54 }
 0x10f   : > { %v490_v2 = vsel %vm489_vm13, %v1759_v29, %v1812_v49  ;;  %v491_v53 = vsel %vm489_vm13, %v1812_v49, %v1759_v29  ;;  %v522_v29 = vld [vmem:[#allocation7 + $0x108] sm:$0xff] }
 0x110   : > { %v495_v28 = vmul.f32 %v493_v3, %v490_v2  ;;  %v496_v62 = vmul.f32 %v494_v25, %v491_v53  ;;  %v591_v3 = vld [vmem:[#allocation7 + $0x150] sm:$0xff]  ;;  %v592_v25 = vld [vmem:[#allocation7 + $0x158] sm:$0xff] }
 0x112   : > { %v502_v5 = vpop.permute.xlu0 %501  ;;  %v1850_v37 = vpop.permute.xlu1 %555  ;;  %v497_v16 = vadd.f32 %v495_v28, %v483_v8 }
 0x113   : > { %v504_v27 = vsel %vm503_vm14, %v1765_v39, %v502_v5  ;;  %v505_v33 = vsel %vm503_vm14, %v502_v5, %v1765_v39  ;;  %v484_v39 = vadd.f32 %v482_v59, %v470_v56 }
 0x114   : > { %v509_v5 = vmul.f32 %v507_v61, %v504_v27  ;;  %v510_v10 = vmul.f32 %v508_v17, %v505_v33  ;;  %v605_v17 = vld [vmem:[#allocation7 + $0x160] sm:$0xff]  ;;  %v606_v27 = vld [vmem:[#allocation7 + $0x168] sm:$0xff] }
 0x115   : > { %v498_v31 = vadd.f32 %v496_v62, %v484_v39 }
 0x116   : > { %v516_v42 = vpop.permute.xlu0 %515  ;;  %v1856_v47 = vpop.permute.xlu1 %569 }
 0x117   : > { %v518_v49 = vsel %vm517_vm15, %v1774_v55, %v516_v42  ;;  %v519_v7 = vsel %vm517_vm15, %v516_v42, %v1774_v55  ;;  %v549_v55 = vld [vmem:[#allocation7 + $0x120] sm:$0xff]  ;;  %v512_v42 = vadd.f32 %v510_v10, %v498_v31 }
 0x118   : > { %v523_v9 = vmul.f32 %v521_v6, %v518_v49  ;;  %v524_v18 = vmul.f32 %v522_v29, %v519_v7  ;;  %v619_v29 = vld [vmem:[#allocation7 + $0x170] sm:$0xff]  ;;  %v620_v49 = vld [vmem:[#allocation7 + $0x178] sm:$0xff] }
 0x11a   : > { %v530_v46 = vpop.permute.xlu0 %529  ;;  %v584_v4 = vpop.permute.xlu1 %583  ;;  %v526_v45 = vadd.f32 %v524_v18, %v512_v42  ;;  %v633_v18 = vld [vmem:[#allocation7 + $0x180] sm:$0xff] }
 0x11b   : > { %v532_v12 = vsel %vm531_vm0, %v1792_v34, %v530_v46  ;;  %v533_v14 = vsel %vm531_vm0, %v530_v46, %v1792_v34  ;;  %v511_v34 = vadd.f32 %v509_v5, %v497_v16 }
 0x11c   : > { %v537_v11 = vmul.f32 %v535_v19, %v532_v12  ;;  %v538_v20 = vmul.f32 %v536_v30, %v533_v14 }
 0x11e   : > { %v544_v15 = vpop.permute.xlu0 %543  ;;  %v598_v38 = vpop.permute.xlu1 %597  ;;  %v540_v51 = vadd.f32 %v538_v20, %v526_v45 }
 0x11f   : > { %v546_v36 = vsel %vm545_vm1, %v1823_v57, %v544_v15  ;;  %v547_v21 = vsel %vm545_vm1, %v544_v15, %v1823_v57  ;;  %v525_v57 = vadd.f32 %v523_v9, %v511_v34 }
 0x120   : > { %v551_v46 = vmul.f32 %v549_v55, %v546_v36  ;;  %v552_v24 = vmul.f32 %v550_v35, %v547_v21 }
 0x122   : > { %v558_v63 = vpop.permute.xlu0 %557  ;;  %v554_v56 = vadd.f32 %v552_v24, %v540_v51 }
 0x123   : > { %v560_v43 = vsel %vm559_vm2, %v1850_v37, %v558_v63  ;;  %v561_v44 = vsel %vm559_vm2, %v558_v63, %v1850_v37  ;;  %v539_v37 = vadd.f32 %v537_v11, %v525_v57  ;;  %v1481_v57 = vmov 839922192  }
 0x124   : > { %v565_v52 = vmul.f32 %v563_v40, %v560_v43  ;;  %v566_v15 = vmul.f32 %v564_v41, %v561_v44  ;;  %v1480_v44 = vmov 2   ;;  %v644_v45 = vunpack.c.l.s4 %v1481_v57 }
 0x125   : > { %v553_v54 = vadd.f32 %v551_v46, %v539_v37  ;;  %1300 = vset.pattern.permute.xlu1 %v1480_v44  ;;  %v1482_v46 = vmov 1985246804  }
 0x126   : > { %v572_v32 = vpop.permute.xlu0 %571  ;;  %v568_v63 = vadd.f32 %v566_v15, %v554_v56  ;;  %v651_v24 = vunpack.c.l.s4 %v1482_v46 }
 0x127   : > { %v574_v48 = vsel %vm573_vm3, %v1856_v47, %v572_v32  ;;  %v575_v50 = vsel %vm573_vm3, %v572_v32, %v1856_v47  ;;  %v612_v47 = vpop.permute.xlu1 %611  ;;  %v567_v62 = vadd.f32 %v565_v52, %v553_v54  ;;  %v634_v32 = vld [vmem:[#allocation7 + $0x188] sm:$0xff] }
 0x128   : > { %v579_v58 = vmul.f32 %v577_v13, %v574_v48  ;;  %v580_v59 = vmul.f32 %v578_v22, %v575_v50  ;;  %v647_v13 = vshrl.u32 %v299_v23, 7  ;;  %v652_v22 = vunpack.c.0.s8 %v651_v24 }
 0x12a   : > { %v586_v60 = vpop.permute.xlu0 %585  ;;  %v581_v7 = vadd.f32 %v579_v58, %v567_v62  ;;  %v582_v8 = vadd.f32 %v580_v59, %v568_v63  ;;  %v1918_v50 = vsub.s32 %v652_v22, %v647_v13 }
 0x12b   : > { %v588_v2 = vsel %vm587_vm4, %v584_v4, %v586_v60  ;;  %v589_v53 = vsel %vm587_vm4, %v586_v60, %v584_v4  ;;  %v626_v9 = vpop.permute.xlu1 %625  ;;  %v645_v60 = vunpack.c.0.s8 %v644_v45 }
 0x12c   : > { %v593_v6 = vmul.f32 %v591_v3, %v588_v2  ;;  %v594_v4 = vmul.f32 %v592_v25, %v589_v53 }
 0x12d   : > { %v1916_v48 = vsub.s32 %v645_v60, %v647_v13 }
 0x12e   : > { %v600_v61 = vpop.permute.xlu0 %599  ;;  %v595_v12 = vadd.f32 %v593_v6, %v581_v7  ;;  %v596_v14 = vadd.f32 %v594_v4, %v582_v8  ;;  %v1483_v8 = vmov 5  }
 0x12f   : > { %v602_v33 = vsel %vm601_vm5, %v598_v38, %v600_v61  ;;  %v603_v28 = vsel %vm601_vm5, %v600_v61, %v598_v38 }
 0x130   : > { %v607_v39 = vmul.f32 %v605_v17, %v602_v33  ;;  %v608_v5 = vmul.f32 %v606_v27, %v603_v28 }
 0x132   : > { %v614_v10 = vpop.permute.xlu0 %613  ;;  %v609_v55 = vadd.f32 %v607_v39, %v595_v12  ;;  %v610_v35 = vadd.f32 %v608_v5, %v596_v14 }
 0x133   : > { %v616_v19 = vsel %vm615_vm6, %v612_v47, %v614_v10  ;;  %v617_v30 = vsel %vm615_vm6, %v614_v10, %v612_v47 }
 0x134   : > { %v621_v16 = vmul.f32 %v619_v29, %v616_v19  ;;  %v622_v31 = vmul.f32 %v620_v49, %v617_v30 }
 0x136   : > { %v628_v36 = vpop.permute.xlu0 %627  ;;  %v623_v42 = vadd.f32 %v621_v16, %v609_v55  ;;  %v624_v11 = vadd.f32 %v622_v31, %v610_v35 }
 0x137   : > { %v630_v21 = vsel %vm629_vm7, %v626_v9, %v628_v36  ;;  %v631_v34 = vsel %vm629_vm7, %v628_v36, %v626_v9 }
 0x138   : > { %v635_v20 = vmul.f32 %v633_v18, %v630_v21  ;;  %v636_v38 = vmul.f32 %v634_v32, %v631_v34 }
 0x13a   : > { %v637_v40 = vadd.f32 %v635_v20, %v623_v42  ;;  %v638_v41 = vadd.f32 %v636_v38, %v624_v11 }
 0x13c   : > { %v639_v43 = vadd.f32 %v638_v41, %v637_v40 }
 0x13e   : > { %640 = vadd.xlane.f32.xlu1 %v639_v43 }
 0x14f   : > { %741 = vperm.xlu1 %1300, %v1678_v1  }
 0x153   : > { %1301 = vset.pattern.permute.xlu1 %v1483_v8 }
 0x154   : > { %756 = vperm.xlu1 %1301, %v1678_v1  }
 0x1cb   : > { %v641_v37 = vpop.xlane.xlu1 %640 }
 0x1cc   : > { %v649_v51 = vrot.slane %v641_v37, %v1916_v48  ;;  %v656_v52 = vrot.slane %v641_v37, %v1918_v50 }
 0x1ce   : > { %v660_v15 = vsel %vm659_vm8, %v649_v51, 0.0  ;;  %v667_v3 = vsel %vm659_vm8, %v656_v52, 0.0 }
 0x1cf   : > { %v661_v25 = vrot.slane %v660_v15, 4  ;;  %v668_v2 = vrot.slane %v667_v3, 4  ;;  %v742_v60 = vpop.permute.xlu1 %741 }
 0x1d1   : > { %v662_v53 = vadd.f32 %v661_v25, %v660_v15  ;;  %v669_v54 = vadd.f32 %v668_v2, %v667_v3 }
 0x1d3   : > { %v663_v23 = vrot.slane %v662_v53, 2  ;;  %v670_v56 = vrot.slane %v669_v54, 2 }
 0x1d5   : > { %v664_v58 = vadd.f32 %v663_v23, %v662_v53  ;;  %v671_v59 = vadd.f32 %v670_v56, %v669_v54  ;;  %v752_v53 = vld [vmem:[%s2025_s3] sm:$0xf]  ;;  %v757_v54 = vpop.permute.xlu1 %756 }
 0x1d7   : > { %v665_v61 = vrot.slane %v664_v58, 1  ;;  %v672_v47 = vrot.slane %v671_v59, 1 }
 0x1d9   : > { %v666_v17 = vadd.f32 %v665_v61, %v664_v58  ;;  %v673_v27 = vadd.f32 %v672_v47, %v671_v59 }
 0x1db   : > { %v674_v33 = vmul.f32 0.0009765625, %v666_v17  ;;  %v675_v28 = vmul.f32 0.0009765625, %v673_v27 }
 0x1dd   : > { %v678_v62 = vcombine.low %v674_v33, %v675_v28  ;;  %v679_v63 = vcombine.high %v674_v33, %v675_v28  ;;  %v1484_v28 = vmov 3  }
 0x1de   : > { %1302 = vset.pattern.permute.xlu1 %v1484_v28 }
 0x1df   : > { %v682_v6 = vsub.f32 %v637_v40, %v678_v62  ;;  %v683_v4 = vsub.f32 %v638_v41, %v679_v63  ;;  %v1485_v62 = vmov 4  }
 0x1e1   : > { %v684_v29 = vmul.f32 %v682_v6, %v682_v6  ;;  %v685_v49 = vmul.f32 %v683_v4, %v683_v4 }
 0x1e3   : > { %v686_v7 = vadd.f32 %v685_v49, %v684_v29 }
 0x1e5   : > { %687 = vadd.xlane.f32.xlu0 %v686_v7 }
 0x1fb   : > { %735 = vperm.xlu0 %1299, %v1678_v1  }
 0x1ff   : > { %1303 = vset.pattern.permute.xlu0 %v1485_v62 }
 0x272   : > { %v688_v39 = vpop.xlane.xlu0 %687 }
 0x273   : > { %v696_v5 = vrot.slane %v688_v39, %v1916_v48  ;;  %v703_v10 = vrot.slane %v688_v39, %v1918_v50 }
 0x275   : > { %v706_v19 = vsel %vm659_vm8, %v696_v5, 0.0  ;;  %v713_v30 = vsel %vm659_vm8, %v703_v10, 0.0 }
 0x276   : > { %v707_v12 = vrot.slane %v706_v19, 4  ;;  %v714_v14 = vrot.slane %v713_v30, 4 }
 0x278   : > { %v708_v16 = vadd.f32 %v707_v12, %v706_v19  ;;  %v715_v31 = vadd.f32 %v714_v14, %v713_v30 }
 0x27a   : > { %v709_v9 = vrot.slane %v708_v16, 2  ;;  %v716_v18 = vrot.slane %v715_v31, 2  ;;  %v736_v45 = vpop.permute.xlu0 %735 }
 0x27c   : > { %v710_v32 = vadd.f32 %v709_v9, %v708_v16  ;;  %v717_v55 = vadd.f32 %v716_v18, %v715_v31 }
 0x27e   : > { %v711_v35 = vrot.slane %v710_v32, 1  ;;  %v718_v36 = vrot.slane %v717_v55, 1 }
 0x280   : > { %v712_v21 = vadd.f32 %v711_v35, %v710_v32  ;;  %v719_v34 = vadd.f32 %v718_v36, %v717_v55 }
 0x282   : > { %v720_v42 = vmul.f32 0.0009765625, %v712_v21  ;;  %v721_v11 = vmul.f32 0.0009765625, %v719_v34 }
 0x284   : > { %v722_v20 = vadd.f32 1e-05, %v720_v42  ;;  %v723_v38 = vadd.f32 1e-05, %v721_v11  ;;  %v1947_v11 = vld [vmem:[%s2027_s5] sm:$0xff] }
 0x286   : > { %1308 = vrsqrt.f32 %v722_v20 }
 0x287   : > { %1310 = vrsqrt.f32 %v723_v38 }
 0x290   : > { %v1309_v40 = vpop.eup %1308 }
 0x291   : > { %v1311_v41 = vpop.eup %1310 }
 0x292   : > { %v728_v43 = vcombine.low %v1309_v40, %v1311_v41  ;;  %v729_v57 = vcombine.high %v1309_v40, %v1311_v41 }
 0x294   : > { %v732_v46 = vmul.f32 %v728_v43, %v682_v6  ;;  %v733_v24 = vmul.f32 %v729_v57, %v683_v4 }
 0x296   : > { %v738_v13 = vmul.f32 %v736_v45, %v732_v46  ;;  %v739_v22 = vmul.f32 %v736_v45, %v733_v24 }
 0x298   : > { %v744_v37 = vadd.f32 %v742_v60, %v738_v13  ;;  %v745_v51 = vadd.f32 %v742_v60, %v739_v22 }
 0x29a   : > { %v746_v52 = vmax.f32 %v744_v37, 0.0  ;;  %v747_v15 = vmax.f32 %v745_v51, 0.0 }
 0x29c   : > { %v754_v3 = vpack.c.bf16 %v747_v15, %v747_v15  ;;  %v753_v25 = vpack.c.bf16 %v746_v52, %v746_v52 }
 0x29e   : > { %1196 = vmatprep.subr.msk.bf16.mxu0 %vm659_vm8, %v754_v3  ;;  %v764_v2 = vsel %vm659_vm8, %v753_v25, 0 }
 0x29f   : > { %770 = vmatpush1.bf16.msra.mxu0 %v764_v2 }
 0x2a2   : > { %1197 = vmatmul.mubr.msk.bf16.vlgmr.msra.gmra.mrb[0].mxu0 %vm759_vm9, %v752_v53 }
 0x375   : > { %v803_v23 = vpop.f32.mrb[0].mxu0 }
 0x376   : > { %v804_v56 = vadd.f32 %v803_v23, %v757_v54  ;;  %v805_v58 = vpop.f32.mrb[1].mxu0 }
 0x377   : > { %v806_v59 = vadd.f32 %v805_v58, %v757_v54  ;;  %v807_v61 = vpop.f32.mrb[2].mxu0 }
 0x378   : > { %v808_v47 = vpop.f32.mrb[3].mxu0  ;;  %v810_v17 = vadd.f32 %v804_v56, %v746_v52 }
 0x379   : > { %v811_v27 = vadd.f32 %v806_v59, %v747_v15 }
 0x37b   : > { %v812_v33 = vadd.f32 %v811_v27, %v810_v17 }
 0x37d   : > { %813 = vadd.xlane.f32.xlu1 %v812_v33 }
 0x38e   : > { %907 = vperm.xlu1 %1302, %v1678_v1  }
 0x392   : > { %1304 = vset.pattern.permute.xlu1 %v1480_v44 }
 0x393   : > { %929 = vperm.xlu1 %1304, %v1947_v11  }
 0x397   : > { %1306 = vset.pattern.permute.xlu1 %v1479_v26 }
 0x40a   : > { %v814_v63 = vpop.xlane.xlu1 %813 }
 0x40b   : > { %v822_v6 = vrot.slane %v814_v63, %v1916_v48  ;;  %v829_v4 = vrot.slane %v814_v63, %v1918_v50 }
 0x40d   : > { %v832_v29 = vsel %vm659_vm8, %v822_v6, 0.0  ;;  %v839_v49 = vsel %vm659_vm8, %v829_v4, 0.0 }
 0x40e   : > { %v833_v7 = vrot.slane %v832_v29, 4  ;;  %v840_v8 = vrot.slane %v839_v49, 4  ;;  %v908_v56 = vpop.permute.xlu1 %907 }
 0x410   : > { %v834_v39 = vadd.f32 %v833_v7, %v832_v29  ;;  %v841_v5 = vadd.f32 %v840_v8, %v839_v49  ;;  %v922_v29 = vld [vmem:[%s2026_s4] sm:$0xf] }
 0x412   : > { %v835_v10 = vrot.slane %v834_v39, 2  ;;  %v842_v19 = vrot.slane %v841_v5, 2  ;;  %v930_v49 = vpop.permute.xlu1 %929 }
 0x414   : > { %v836_v30 = vadd.f32 %v835_v10, %v834_v39  ;;  %v843_v12 = vadd.f32 %v842_v19, %v841_v5 }
 0x416   : > { %v837_v14 = vrot.slane %v836_v30, 1  ;;  %v844_v16 = vrot.slane %v843_v12, 1 }
 0x418   : > { %v838_v44 = vadd.f32 %v837_v14, %v836_v30  ;;  %v845_v31 = vadd.f32 %v844_v16, %v843_v12 }
 0x41a   : > { %v846_v9 = vmul.f32 0.0009765625, %v838_v44  ;;  %v847_v18 = vmul.f32 0.0009765625, %v845_v31 }
 0x41c   : > { %v850_v32 = vcombine.low %v846_v9, %v847_v18  ;;  %v851_v55 = vcombine.high %v846_v9, %v847_v18 }
 0x41e   : > { %v854_v35 = vsub.f32 %v810_v17, %v850_v32  ;;  %v855_v36 = vsub.f32 %v811_v27, %v851_v55 }
 0x420   : > { %v856_v21 = vmul.f32 %v854_v35, %v854_v35  ;;  %v857_v34 = vmul.f32 %v855_v36, %v855_v36 }
 0x422   : > { %v858_v42 = vadd.f32 %v857_v34, %v856_v21 }
 0x424   : > { %859 = vadd.xlane.f32.xlu0 %v858_v42 }
 0x43a   : > { %913 = vperm.xlu0 %1303, %v1678_v1  }
 0x43e   : > { %1305 = vset.pattern.permute.xlu0 %v1454_v0 }
 0x43f   : > { %1077 = vperm.xlu0 %1305, %v1947_v11  }
 0x443   : > { %1307 = vset.pattern.permute.xlu0 %v1479_v26 }
 0x4b1   : > { %v860_v20 = vpop.xlane.xlu0 %859 }
 0x4b2   : > { %v868_v38 = vrot.slane %v860_v20, %v1916_v48  ;;  %v875_v1 = vrot.slane %v860_v20, %v1918_v50 }
 0x4b4   : > { %v878_v0 = vsel %vm659_vm8, %v868_v38, 0.0  ;;  %v885_v40 = vsel %vm659_vm8, %v875_v1, 0.0 }
 0x4b5   : > { %v879_v41 = vrot.slane %v878_v0, 4  ;;  %v886_v43 = vrot.slane %v885_v40, 4 }
 0x4b7   : > { %v880_v57 = vadd.f32 %v879_v41, %v878_v0  ;;  %v887_v45 = vadd.f32 %v886_v43, %v885_v40 }
 0x4b9   : > { %v881_v46 = vrot.slane %v880_v57, 2  ;;  %v888_v24 = vrot.slane %v887_v45, 2  ;;  %v914_v61 = vpop.permute.xlu0 %913 }
 0x4bb   : > { %v882_v60 = vadd.f32 %v881_v46, %v880_v57  ;;  %v889_v13 = vadd.f32 %v888_v24, %v887_v45 }
 0x4bd   : > { %v883_v22 = vrot.slane %v882_v60, 1  ;;  %v890_v37 = vrot.slane %v889_v13, 1 }
 0x4bf   : > { %v884_v26 = vadd.f32 %v883_v22, %v882_v60  ;;  %v891_v51 = vadd.f32 %v890_v37, %v889_v13 }
 0x4c1   : > { %v892_v52 = vmul.f32 0.0009765625, %v884_v26  ;;  %v893_v15 = vmul.f32 0.0009765625, %v891_v51 }
 0x4c3   : > { %v894_v3 = vadd.f32 1e-05, %v892_v52  ;;  %v895_v25 = vadd.f32 1e-05, %v893_v15 }
 0x4c5   : > { %1312 = vrsqrt.f32 %v894_v3 }
 0x4c6   : > { %1314 = vrsqrt.f32 %v895_v25 }
 0x4cf   : > { %v1313_v2 = vpop.eup %1312 }
 0x4d0   : > { %v1315_v53 = vpop.eup %1314 }
 0x4d1   : > { %v900_v54 = vcombine.low %v1313_v2, %v1315_v53  ;;  %v901_v23 = vcombine.high %v1313_v2, %v1315_v53 }
 0x4d3   : > { %v904_v58 = vmul.f32 %v900_v54, %v854_v35  ;;  %v905_v59 = vmul.f32 %v901_v23, %v855_v36 }
 0x4d5   : > { %v910_v47 = vmul.f32 %v908_v56, %v904_v58  ;;  %v911_v17 = vmul.f32 %v908_v56, %v905_v59 }
 0x4d7   : > { %v916_v27 = vadd.f32 %v914_v61, %v910_v47  ;;  %v917_v33 = vadd.f32 %v914_v61, %v911_v17 }
 0x4d9   : > { %v918_v28 = vmax.f32 %v916_v27, 0.0  ;;  %v919_v62 = vmax.f32 %v917_v33, 0.0 }
 0x4db   : > { %v926_v63 = vpack.c.bf16 %v919_v62, %v919_v62  ;;  %v925_v6 = vpack.c.bf16 %v918_v28, %v918_v28  ;;  %v1078_v62 = vpop.permute.xlu0 %1077 }
 0x4dd   : > { %1198 = vmatprep.subr.msk.bf16.mxu1 %vm659_vm8, %v926_v63  ;;  %v936_v4 = vsel %vm659_vm8, %v925_v6, 0 }
 0x4de   : > { %942 = vmatpush1.bf16.msra.mxu1 %v936_v4 }
 0x4e1   : > { %1199 = vmatmul.mubr.msk.bf16.vlgmr.msra.gmra.mrb[0].mxu1 %vm759_vm9, %v922_v29 }
 0x5b4   : > { %v975_v7 = vpop.f32.mrb[0].mxu1 }
 0x5b5   : > { %v976_v8 = vadd.f32 %v975_v7, %v930_v49  ;;  %v977_v39 = vpop.f32.mrb[1].mxu1 }
 0x5b6   : > { %v978_v5 = vadd.f32 %v977_v39, %v930_v49  ;;  %v979_v10 = vpop.f32.mrb[2].mxu1 }
 0x5b7   : > { %v980_v19 = vpop.f32.mrb[3].mxu1 }
 0x5b8   : > { %v982_v30 = vadd.f32 %v978_v5, %v976_v8 }
 0x5ba   : > { %983 = vadd.xlane.f32.xlu1 %v982_v30 }
 0x647   : > { %v984_v12 = vpop.xlane.xlu1 %983 }
 0x648   : > { %v992_v14 = vrot.slane %v984_v12, %v1916_v48  ;;  %v999_v16 = vrot.slane %v984_v12, %v1918_v50 }
 0x64a   : > { %v1002_v44 = vsel %vm659_vm8, %v992_v14, 0.0  ;;  %v1009_v31 = vsel %vm659_vm8, %v999_v16, 0.0 }
 0x64b   : > { %v1003_v9 = vrot.slane %v1002_v44, 4  ;;  %v1010_v18 = vrot.slane %v1009_v31, 4 }
 0x64d   : > { %v1004_v32 = vadd.f32 %v1003_v9, %v1002_v44  ;;  %v1011_v55 = vadd.f32 %v1010_v18, %v1009_v31 }
 0x64f   : > { %v1005_v35 = vrot.slane %v1004_v32, 2  ;;  %v1012_v36 = vrot.slane %v1011_v55, 2 }
 0x651   : > { %v1006_v21 = vadd.f32 %v1005_v35, %v1004_v32  ;;  %v1013_v34 = vadd.f32 %v1012_v36, %v1011_v55 }
 0x653   : > { %v1007_v42 = vrot.slane %v1006_v21, 1  ;;  %v1014_v20 = vrot.slane %v1013_v34, 1 }
 0x655   : > { %v1008_v38 = vadd.f32 %v1007_v42, %v1006_v21  ;;  %v1015_v1 = vadd.f32 %v1014_v20, %v1013_v34 }
 0x657   : > { %v1016_v0 = vmul.f32 0.0009765625, %v1008_v38  ;;  %v1017_v40 = vmul.f32 0.0009765625, %v1015_v1 }
 0x659   : > { %v1020_v41 = vcombine.low %v1016_v0, %v1017_v40  ;;  %v1021_v43 = vcombine.high %v1016_v0, %v1017_v40 }
 0x65b   : > { %v1024_v57 = vsub.f32 %v976_v8, %v1020_v41  ;;  %v1025_v45 = vsub.f32 %v978_v5, %v1021_v43 }
 0x65d   : > { %v1026_v46 = vmul.f32 %v1024_v57, %v1024_v57  ;;  %v1027_v24 = vmul.f32 %v1025_v45, %v1025_v45 }
 0x65f   : > { %v1028_v60 = vadd.f32 %v1027_v24, %v1026_v46 }
 0x661   : > { %1029 = vadd.xlane.f32.xlu1 %v1028_v60 }
 0x672   : > { %1083 = vperm.xlu1 %1306, %v1947_v11  }
 0x6ee   : > { %v1030_v13 = vpop.xlane.xlu1 %1029 }
 0x6ef   : > { %v1038_v22 = vrot.slane %v1030_v13, %v1916_v48  ;;  %v1045_v37 = vrot.slane %v1030_v13, %v1918_v50 }
 0x6f1   : > { %v1048_v26 = vsel %vm659_vm8, %v1038_v22, 0.0  ;;  %v1055_v51 = vsel %vm659_vm8, %v1045_v37, 0.0 }
 0x6f2   : > { %v1049_v52 = vrot.slane %v1048_v26, 4  ;;  %v1056_v15 = vrot.slane %v1055_v51, 4  ;;  %v1084_v4 = vpop.permute.xlu1 %1083 }
 0x6f4   : > { %v1050_v3 = vadd.f32 %v1049_v52, %v1048_v26  ;;  %v1057_v25 = vadd.f32 %v1056_v15, %v1055_v51 }
 0x6f6   : > { %v1051_v2 = vrot.slane %v1050_v3, 2  ;;  %v1058_v53 = vrot.slane %v1057_v25, 2 }
 0x6f8   : > { %v1052_v54 = vadd.f32 %v1051_v2, %v1050_v3  ;;  %v1059_v23 = vadd.f32 %v1058_v53, %v1057_v25 }
 0x6fa   : > { %v1053_v56 = vrot.slane %v1052_v54, 1  ;;  %v1060_v58 = vrot.slane %v1059_v23, 1 }
 0x6fc   : > { %v1054_v11 = vadd.f32 %v1053_v56, %v1052_v54  ;;  %v1061_v59 = vadd.f32 %v1060_v58, %v1059_v23 }
 0x6fe   : > { %v1062_v48 = vmul.f32 0.0009765625, %v1054_v11  ;;  %v1063_v50 = vmul.f32 0.0009765625, %v1061_v59 }
 0x700   : > { %v1064_v61 = vadd.f32 1e-05, %v1062_v48  ;;  %v1065_v47 = vadd.f32 1e-05, %v1063_v50 }
 0x702   : > { %1316 = vrsqrt.f32 %v1064_v61 }
 0x703   : > { %1318 = vrsqrt.f32 %v1065_v47 }
 0x70c   : > { %v1317_v17 = vpop.eup %1316 }
 0x70d   : > { %v1319_v27 = vpop.eup %1318 }
 0x70e   : > { %v1070_v33 = vcombine.low %v1317_v17, %v1319_v27  ;;  %v1071_v28 = vcombine.high %v1317_v17, %v1319_v27 }
 0x710   : > { %v1074_v63 = vmul.f32 %v1070_v33, %v1024_v57  ;;  %v1075_v6 = vmul.f32 %v1071_v28, %v1025_v45 }
 0x712   : > { %v1080_v29 = vmul.f32 %v1078_v62, %v1074_v63  ;;  %v1081_v49 = vmul.f32 %v1078_v62, %v1075_v6 }
 0x714   : > { %v1086_v7 = vadd.f32 %v1084_v4, %v1080_v29  ;;  %v1087_v8 = vadd.f32 %v1084_v4, %v1081_v49 }
 0x716   : > { %1088 = vst [vmem:[%s282_s15] sm:$0xff] %v1086_v7  ;;  %1089 = vst [vmem:[%s282_s15 + $0x8] sm:$0xff] %v1087_v8 }
 0x717   : > { %1391 = shalt.err (!%p1388_p7)
}
 0x718   : > { %s1392_s26 = scalar_lea.hbm %s1978_s16, 256  ;;  %s1396_s11 = scalar_lea.hbm %s2028_s6, 512 }
 0x719   : > { %p1393_p9 = scmp.ne.s32.totalorder %s1978_s16, %s1392_s26  ;;  %p1397_p0 = scmp.lt.u32.totalorder %s1978_s16, %s2028_s6 }
 0x71a   : > { %p1398_p11 = scmp.lt.u32.totalorder %s1396_s11, %s1392_s26  ;;  %p1400_p4 = scmp.lt.u32.totalorder %s1392_s26, %s1978_s16 }
 0x71b   : > { %p1394_p2 = pnand %p1393_p9, %p1613_p12 }
 0x71c   : > { %p1399_p1 = por %p1398_p11, %p1397_p0 }
 0x71d   : > { %p1395_p5 = pneg %p1394_p2 }
 0x71e   : > { %p1401_p6 = por %p1400_p4, %p1399_p1 }
 0x720   : > { %p1402_p8 = pnand %p1401_p6, %p1395_p5 }
 0x722   : > { %1405 = shalt.err (!%p1402_p8)
}
 0x723   : > { %1213 = dma.vmem_to_hbm [thread:$0]  (%p1613_p12), %s1980_s18, 256, %s1978_s16, %s1091_s25  }
 0x724 PF: > { %s1117_s15 = sand.u32 1, %s1436_s21   ;;  %p2043_p10 = scmp.ne.s32.totalorder %s2033_s28, 0 }
 0x725   : > { %p2044_p13 = scmp.ge.s32.totalorder %s1448_s24, 2  ;;  %s1118_s7 = scalar_lea.sflag [#allocation6], %s1117_s15 }
 0x727   : > { %p1224_p3 = pnand %p2044_p13, %p2043_p10 }
 0x729   : > { %1431 = dma.done.wait (!%p1224_p3), %s1118_s7, 256  }
 0x72a   : > { %1433 = vsyncadd (!%p1224_p3), %s1118_s7, 4294967040  ;;  %p20_p7 = scmp.ge.s32.totalorder %s1578_s9, 4   ;;  %s2045_s21 = smov %s1440_s22 }
 0x72b   : > { %s2046_s22 = smov %s1444_s23  ;;  %s2047_s23 = smov %s1609_s13 }
 0x72c   : > { %s2048_s24 = smov %s1578_s9  ;;  %22 = sbr.rel (!%p20_p7) target bundleno = 6 (0x6), region = 117 }
 0x733   :  { %1123 = vsyncpa [#allocation5], 1 }
 0x734   :  { %1125 = vsyncpa [#allocation5 + $0x1], 1 }
 0x735   :  { %1126 = vsyncpa [#allocation8], 1 }
 0x736   :  { %1127 = vsyncpa [#allocation6], 1 }
 0x737   :  { %1129 = vsyncpa [#allocation6 + $0x1], 1 }

</bundles_post_ra>
